<compile_context>
chip_gen: v7x
topology: tpu7x:2x2x1
jax: 0.10.0
libtpu: 0.0.40
codegen_flags: <defaults>
</compile_context>

<pallas_src>
import jax
import jax.numpy as jnp
from jax import lax
from jax.experimental import pallas as pl
from jax.experimental.pallas import tpu as pltpu

LEAKY_SLOPE = 0.01   # nn.LeakyReLU default
BN_EPS = 1e-5        # nn.BatchNorm2d default

_VMEM_LIMIT_BYTES = 32 * 1024 * 1024


def _conv_rows(x_ref, w_ref, *, G, OH, OW, Cin, Cout, kh, kw, stride):
    """Conv for one image-group tile: kh*kw shifted MXU matmuls, f32 accumulation.

    x_ref: (G, Hp, Wp, Cin) spatially padded NHWC tile in VMEM
    w_ref: (kh*kw, Cin, Cout) weight, (kh, kw)-major
    returns (G*OH*OW, Cout) f32
    """
    rows = G * OH * OW
    acc = jnp.zeros((rows, Cout), jnp.float32)
    for idx in range(kh * kw):
        i, j = idx // kw, idx % kw
        if stride == 1:
            patch = x_ref[:, pl.ds(i, OH), pl.ds(j, OW), :]
        else:
            patch = x_ref[:, pl.ds(i, OH, stride=stride),
                          pl.ds(j, OW, stride=stride), :]
        patch = patch.reshape(rows, Cin)
        acc = acc + jnp.dot(patch, w_ref[idx], preferred_element_type=jnp.float32)
    return acc


def _make_stats_kernel(G, OH, OW, Cin, Cout, kh, kw, stride):
    def kernel(x_ref, w_ref, stat_ref):
        y = _conv_rows(x_ref, w_ref, G=G, OH=OH, OW=OW, Cin=Cin, Cout=Cout,
                       kh=kh, kw=kw, stride=stride)
        # single merged (1, 2, Cout) stats block: row 0 = sum(y), row 1 = sum(y*y)
        s1 = jnp.sum(y, axis=0, keepdims=True)        # (1, Cout), f32
        s2 = jnp.sum(y * y, axis=0, keepdims=True)    # (1, Cout), f32
        stat_ref[:, 0:1, :] = s1[None]
        stat_ref[:, 1:2, :] = s2[None]
    return kernel


def _make_bn_act_kernel(G, OH, OW, Cin, Cout, kh, kw, stride):
    OHW = OH * OW

    def kernel(x_ref, w_ref, scale_ref, shift_ref, o_ref):
        y = _conv_rows(x_ref, w_ref, G=G, OH=OH, OW=OW, Cin=Cin, Cout=Cout,
                       kh=kh, kw=kw, stride=stride)
        z = y * scale_ref[...] + shift_ref[...]          # folded BN: one FMA / element
        z = jnp.where(z >= 0, z, LEAKY_SLOPE * z)        # LeakyReLU (f32 VPU math)
        zt = z.T                                         # (Cout, G*OHW): store C-major
        for g in range(G):
            o_ref[g] = zt[:, g * OHW:(g + 1) * OHW]
    return kernel


def block_forward(x, weight, bias, gamma, beta, *, stride, padding, kernel,
                  target_rows=1024):
    """x: [N, C_in, H, W] (NCHW, like PyTorch). Returns [N, C_out, OH, OW]."""
    # The conv bias is exactly cancelled by the train-mode BN mean subtraction
    # (y + b - mean(y + b) = y - mean(y)).
    # TODO(synk): if this block is ever run with eval-mode / running BN statistics the
    # bias must be re-added.
    del bias
    N, Cin, H, W = x.shape
    Cout = weight.shape[0]
    kh = kw = kernel
    OH = (H + 2 * padding - kh) // stride + 1
    OW = (W + 2 * padding - kw) // stride + 1
    OHW = OH * OW
    M = N * OHW
    Hp = H + 2 * padding
    Wp = W + 2 * padding

    # Images per grid step: ~target_rows rows/step, but keep nt >= 2 when N >= 2 so the
    # "parallel" grid axis actually splits across v7x's two TensorCores; G must divide N.
    G = max(1, min(target_rows // max(OHW, 1), N))
    if N >= 2:
        G = max(1, min(G, N // 2))
    while N % G:
        G -= 1
    nt = N // G

    # Cheap XLA glue: NCHW -> padded NHWC (one fused transpose+pad pass over the input),
    # and conv weight [Cout, Cin, kh, kw] -> (kh*kw, Cin, Cout).
    # TODO(synk): on v6e/v7x cast xp / w_r to bf16 (keep f32 MXU accumulation) to halve
    # the HBM input reads; kept f32 here so the result matches the f32 module to 1e-4.
    x_nhwc = jnp.transpose(x.astype(jnp.float32), (0, 2, 3, 1))
    xp = jnp.pad(x_nhwc, ((0, 0), (padding, padding), (padding, padding), (0, 0)))
    w_r = jnp.transpose(weight.astype(jnp.float32), (2, 3, 1, 0)).reshape(kh * kw, Cin, Cout)

    cparams = pltpu.CompilerParams(
        dimension_semantics=("parallel",),       # image-group tiles are independent
        vmem_limit_bytes=_VMEM_LIMIT_BYTES,
    )
    x_spec = pl.BlockSpec((G, Hp, Wp, Cin), lambda i: (i, 0, 0, 0))
    w_spec = pl.BlockSpec((kh * kw, Cin, Cout), lambda i: (0, 0, 0))   # constant block

    # ---- pass 1: per-tile BN partial stats only (no activation temp written to HBM) ----
    stats = pl.pallas_call(
        _make_stats_kernel(G, OH, OW, Cin, Cout, kh, kw, stride),
        out_shape=jax.ShapeDtypeStruct((nt, 2, Cout), jnp.float32),
        grid=(nt,),
        in_specs=[x_spec, w_spec],
        out_specs=pl.BlockSpec((1, 2, Cout), lambda i: (i, 0, 0)),
        compiler_params=cparams,
    )(xp, w_r)

    # ---- tiny cross-tile reduction; fold BN into one per-channel (scale, shift) ----
    s = jnp.sum(stats, axis=0)                               # (2, Cout), f32
    mean = s[0] / M
    # TODO(synk): E[y^2] - E[y]^2 is cancellation-prone when |mean| >> std; switch to
    # per-tile centered stats merged with Chan's formula if tighter tolerance is needed.
    var = jnp.maximum(s[1] / M - mean * mean, 0.0)
    scale = gamma.astype(jnp.float32) * lax.rsqrt(var + BN_EPS)
    shift = beta.astype(jnp.float32) - mean * scale
    scale_row = scale.reshape(1, Cout)
    shift_row = shift.reshape(1, Cout)

    # ---- pass 2: recompute conv (K tiny) + fused BN FMA + LeakyReLU, C-major store ----
    out = pl.pallas_call(
        _make_bn_act_kernel(G, OH, OW, Cin, Cout, kh, kw, stride),
        out_shape=jax.ShapeDtypeStruct((N, Cout, OHW), jnp.float32),
        grid=(nt,),
        in_specs=[x_spec, w_spec,
                  pl.BlockSpec((1, Cout), lambda i: (0, 0)),
                  pl.BlockSpec((1, Cout), lambda i: (0, 0))],
        out_specs=pl.BlockSpec((G, Cout, OHW), lambda i: (i, 0, 0)),
        compiler_params=cparams,
    )(xp, w_r, scale_row, shift_row)

    # (N, Cout, OH*OW) -> (N, Cout, OH, OW): pure reshape, no HBM transpose pass.
    return out.reshape(N, Cout, OH, OW)


def _reference(x, weight, bias, gamma, beta, *, stride, padding):
    """Pure-JAX reference of the same forward pass (for a sanity check)."""
    y = lax.conv_general_dilated(
        x.astype(jnp.float32), weight.astype(jnp.float32),
        window_strides=(stride, stride),
        padding=((padding, padding), (padding, padding)),
        dimension_numbers=("NCHW", "OIHW", "NCHW"))
    y = y + bias.reshape(1, -1, 1, 1)
    mean = jnp.mean(y, axis=(0, 2, 3), keepdims=True)
    var = jnp.mean((y - mean) ** 2, axis=(0, 2, 3), keepdims=True)
    y = (y - mean) * lax.rsqrt(var + BN_EPS)
    y = y * gamma.reshape(1, -1, 1, 1) + beta.reshape(1, -1, 1, 1)
    return jnp.where(y >= 0, y, LEAKY_SLOPE * y)


if __name__ == "__main__":
    # Block(in_f=4, out_f=8, stride=1, padding=1, kernel=3) at small shapes.
    in_f, out_f, stride, padding, kernel = 4, 8, 1, 1, 3
    N, H, W = 2, 16, 16

    key = jax.random.PRNGKey(0)
    kx, kw_, kb = jax.random.split(key, 3)

    x = jax.random.normal(kx, (N, in_f, H, W), dtype=jnp.float32)

    # deterministic parameter init (shapes per nn.Conv2d / nn.BatchNorm2d)
    fan_in = in_f * kernel * kernel
    bound = 1.0 / (fan_in ** 0.5)
    conv_w = jax.random.uniform(kw_, (out_f, in_f, kernel, kernel),
                                minval=-bound, maxval=bound, dtype=jnp.float32)
    conv_b = jax.random.uniform(kb, (out_f,), minval=-bound, maxval=bound,
                                dtype=jnp.float32)
    bn_gamma = jnp.ones((out_f,), jnp.float32)   # BatchNorm2d default init
    bn_beta = jnp.zeros((out_f,), jnp.float32)

    out = block_forward(x, conv_w, conv_b, bn_gamma, bn_beta,
                        stride=stride, padding=padding, kernel=kernel)
    out = jax.block_until_ready(out)

    ref = _reference(x, conv_w, conv_b, bn_gamma, bn_beta,
                     stride=stride, padding=padding)
    assert out.shape == (N, out_f, H, W)
    assert jnp.allclose(out, ref, rtol=1e-4, atol=1e-4)

    print("KERNEL_OK")
</pallas_src>

<mosaic_0001>
module attributes {stable_mosaic.version = 11 : i64} {
  func.func @kernel(%arg0: i32, %arg1: memref<1x18x18x4xf32, #tpu.memory_space<vmem>>, %arg2: memref<9x4x8xf32, #tpu.memory_space<vmem>>, %arg3: memref<1x2x8xf32, #tpu.memory_space<vmem>>) attributes {dimension_semantics = [#tpu.dimension_semantics<parallel>], iteration_bounds = array<i64: 2>, scalar_prefetch = 0 : i64, scratch_operands = 0 : i64, tpu.core_type = #tpu.core_type<tc>, window_params = [{transform_indices = @transform_0, window_bounds = array<i64: 1, 18, 18, 4>}, {pipeline_mode = #tpu.pipeline_mode<synchronous>, transform_indices = @transform_1, window_bounds = array<i64: 9, 4, 8>}, {transform_indices = @transform_2, window_bounds = array<i64: 1, 2, 8>}]} {
    %cst = arith.constant 0.000000e+00 : f32
    %0 = vector.broadcast %cst : f32 to vector<256x8xf32>
    %c0 = arith.constant 0 : index
    %c0_0 = arith.constant 0 : index
    %c0_1 = arith.constant 0 : index
    %c0_2 = arith.constant 0 : index
    %1 = vector.load %arg1[%c0, %c0_0, %c0_1, %c0_2] : memref<1x18x18x4xf32, #tpu.memory_space<vmem>>, vector<1x16x16x4xf32>
    %2 = vector.shape_cast %1 : vector<1x16x16x4xf32> to vector<256x4xf32>
    %c0_3 = arith.constant 0 : index
    %c0_4 = arith.constant 0 : index
    %c0_5 = arith.constant 0 : index
    %3 = vector.load %arg2[%c0_3, %c0_4, %c0_5] : memref<9x4x8xf32, #tpu.memory_space<vmem>>, vector<1x4x8xf32>
    %4 = vector.shape_cast %3 : vector<1x4x8xf32> to vector<4x8xf32>
    %cst_6 = arith.constant dense<0.000000e+00> : vector<256x8xf32>
    %5 = tpu.matmul %2, %4, %cst_6 {dimension_numbers = #tpu.dot_dimension_numbers<[1], [0], [0], [1], [0, 0, 1, 1], [], []>} : vector<256x4xf32>, vector<4x8xf32>, vector<256x8xf32> -> vector<256x8xf32>
    %6 = arith.addf %0, %5 : vector<256x8xf32>
    %c0_7 = arith.constant 0 : index
    %c0_8 = arith.constant 0 : index
    %c1 = arith.constant 1 : index
    %c0_9 = arith.constant 0 : index
    %7 = vector.load %arg1[%c0_7, %c0_8, %c1, %c0_9] : memref<1x18x18x4xf32, #tpu.memory_space<vmem>>, vector<1x16x16x4xf32>
    %8 = vector.shape_cast %7 : vector<1x16x16x4xf32> to vector<256x4xf32>
    %c1_10 = arith.constant 1 : index
    %c0_11 = arith.constant 0 : index
    %c0_12 = arith.constant 0 : index
    %9 = vector.load %arg2[%c1_10, %c0_11, %c0_12] : memref<9x4x8xf32, #tpu.memory_space<vmem>>, vector<1x4x8xf32>
    %10 = vector.shape_cast %9 : vector<1x4x8xf32> to vector<4x8xf32>
    %cst_13 = arith.constant dense<0.000000e+00> : vector<256x8xf32>
    %11 = tpu.matmul %8, %10, %cst_13 {dimension_numbers = #tpu.dot_dimension_numbers<[1], [0], [0], [1], [0, 0, 1, 1], [], []>} : vector<256x4xf32>, vector<4x8xf32>, vector<256x8xf32> -> vector<256x8xf32>
    %12 = arith.addf %6, %11 : vector<256x8xf32>
    %c0_14 = arith.constant 0 : index
    %c0_15 = arith.constant 0 : index
    %c2 = arith.constant 2 : index
    %c0_16 = arith.constant 0 : index
    %13 = vector.load %arg1[%c0_14, %c0_15, %c2, %c0_16] : memref<1x18x18x4xf32, #tpu.memory_space<vmem>>, vector<1x16x16x4xf32>
    %14 = vector.shape_cast %13 : vector<1x16x16x4xf32> to vector<256x4xf32>
    %c2_17 = arith.constant 2 : index
    %c0_18 = arith.constant 0 : index
    %c0_19 = arith.constant 0 : index
    %15 = vector.load %arg2[%c2_17, %c0_18, %c0_19] : memref<9x4x8xf32, #tpu.memory_space<vmem>>, vector<1x4x8xf32>
    %16 = vector.shape_cast %15 : vector<1x4x8xf32> to vector<4x8xf32>
    %cst_20 = arith.constant dense<0.000000e+00> : vector<256x8xf32>
    %17 = tpu.matmul %14, %16, %cst_20 {dimension_numbers = #tpu.dot_dimension_numbers<[1], [0], [0], [1], [0, 0, 1, 1], [], []>} : vector<256x4xf32>, vector<4x8xf32>, vector<256x8xf32> -> vector<256x8xf32>
    %18 = arith.addf %12, %17 : vector<256x8xf32>
    %c0_21 = arith.constant 0 : index
    %c1_22 = arith.constant 1 : index
    %c0_23 = arith.constant 0 : index
    %c0_24 = arith.constant 0 : index
    %19 = vector.load %arg1[%c0_21, %c1_22, %c0_23, %c0_24] : memref<1x18x18x4xf32, #tpu.memory_space<vmem>>, vector<1x16x16x4xf32>
    %20 = vector.shape_cast %19 : vector<1x16x16x4xf32> to vector<256x4xf32>
    %c3 = arith.constant 3 : index
    %c0_25 = arith.constant 0 : index
    %c0_26 = arith.constant 0 : index
    %21 = vector.load %arg2[%c3, %c0_25, %c0_26] : memref<9x4x8xf32, #tpu.memory_space<vmem>>, vector<1x4x8xf32>
    %22 = vector.shape_cast %21 : vector<1x4x8xf32> to vector<4x8xf32>
    %cst_27 = arith.constant dense<0.000000e+00> : vector<256x8xf32>
    %23 = tpu.matmul %20, %22, %cst_27 {dimension_numbers = #tpu.dot_dimension_numbers<[1], [0], [0], [1], [0, 0, 1, 1], [], []>} : vector<256x4xf32>, vector<4x8xf32>, vector<256x8xf32> -> vector<256x8xf32>
    %24 = arith.addf %18, %23 : vector<256x8xf32>
    %c0_28 = arith.constant 0 : index
    %c1_29 = arith.constant 1 : index
    %c1_30 = arith.constant 1 : index
    %c0_31 = arith.constant 0 : index
    %25 = vector.load %arg1[%c0_28, %c1_29, %c1_30, %c0_31] : memref<1x18x18x4xf32, #tpu.memory_space<vmem>>, vector<1x16x16x4xf32>
    %26 = vector.shape_cast %25 : vector<1x16x16x4xf32> to vector<256x4xf32>
    %c4 = arith.constant 4 : index
    %c0_32 = arith.constant 0 : index
    %c0_33 = arith.constant 0 : index
    %27 = vector.load %arg2[%c4, %c0_32, %c0_33] : memref<9x4x8xf32, #tpu.memory_space<vmem>>, vector<1x4x8xf32>
    %28 = vector.shape_cast %27 : vector<1x4x8xf32> to vector<4x8xf32>
    %cst_34 = arith.constant dense<0.000000e+00> : vector<256x8xf32>
    %29 = tpu.matmul %26, %28, %cst_34 {dimension_numbers = #tpu.dot_dimension_numbers<[1], [0], [0], [1], [0, 0, 1, 1], [], []>} : vector<256x4xf32>, vector<4x8xf32>, vector<256x8xf32> -> vector<256x8xf32>
    %30 = arith.addf %24, %29 : vector<256x8xf32>
    %c0_35 = arith.constant 0 : index
    %c1_36 = arith.constant 1 : index
    %c2_37 = arith.constant 2 : index
    %c0_38 = arith.constant 0 : index
    %31 = vector.load %arg1[%c0_35, %c1_36, %c2_37, %c0_38] : memref<1x18x18x4xf32, #tpu.memory_space<vmem>>, vector<1x16x16x4xf32>
    %32 = vector.shape_cast %31 : vector<1x16x16x4xf32> to vector<256x4xf32>
    %c5 = arith.constant 5 : index
    %c0_39 = arith.constant 0 : index
    %c0_40 = arith.constant 0 : index
    %33 = vector.load %arg2[%c5, %c0_39, %c0_40] : memref<9x4x8xf32, #tpu.memory_space<vmem>>, vector<1x4x8xf32>
    %34 = vector.shape_cast %33 : vector<1x4x8xf32> to vector<4x8xf32>
    %cst_41 = arith.constant dense<0.000000e+00> : vector<256x8xf32>
    %35 = tpu.matmul %32, %34, %cst_41 {dimension_numbers = #tpu.dot_dimension_numbers<[1], [0], [0], [1], [0, 0, 1, 1], [], []>} : vector<256x4xf32>, vector<4x8xf32>, vector<256x8xf32> -> vector<256x8xf32>
    %36 = arith.addf %30, %35 : vector<256x8xf32>
    %c0_42 = arith.constant 0 : index
    %c2_43 = arith.constant 2 : index
    %c0_44 = arith.constant 0 : index
    %c0_45 = arith.constant 0 : index
    %37 = vector.load %arg1[%c0_42, %c2_43, %c0_44, %c0_45] : memref<1x18x18x4xf32, #tpu.memory_space<vmem>>, vector<1x16x16x4xf32>
    %38 = vector.shape_cast %37 : vector<1x16x16x4xf32> to vector<256x4xf32>
    %c6 = arith.constant 6 : index
    %c0_46 = arith.constant 0 : index
    %c0_47 = arith.constant 0 : index
    %39 = vector.load %arg2[%c6, %c0_46, %c0_47] : memref<9x4x8xf32, #tpu.memory_space<vmem>>, vector<1x4x8xf32>
    %40 = vector.shape_cast %39 : vector<1x4x8xf32> to vector<4x8xf32>
    %cst_48 = arith.constant dense<0.000000e+00> : vector<256x8xf32>
    %41 = tpu.matmul %38, %40, %cst_48 {dimension_numbers = #tpu.dot_dimension_numbers<[1], [0], [0], [1], [0, 0, 1, 1], [], []>} : vector<256x4xf32>, vector<4x8xf32>, vector<256x8xf32> -> vector<256x8xf32>
    %42 = arith.addf %36, %41 : vector<256x8xf32>
    %c0_49 = arith.constant 0 : index
    %c2_50 = arith.constant 2 : index
    %c1_51 = arith.constant 1 : index
    %c0_52 = arith.constant 0 : index
    %43 = vector.load %arg1[%c0_49, %c2_50, %c1_51, %c0_52] : memref<1x18x18x4xf32, #tpu.memory_space<vmem>>, vector<1x16x16x4xf32>
    %44 = vector.shape_cast %43 : vector<1x16x16x4xf32> to vector<256x4xf32>
    %c7 = arith.constant 7 : index
    %c0_53 = arith.constant 0 : index
    %c0_54 = arith.constant 0 : index
    %45 = vector.load %arg2[%c7, %c0_53, %c0_54] : memref<9x4x8xf32, #tpu.memory_space<vmem>>, vector<1x4x8xf32>
    %46 = vector.shape_cast %45 : vector<1x4x8xf32> to vector<4x8xf32>
    %cst_55 = arith.constant dense<0.000000e+00> : vector<256x8xf32>
    %47 = tpu.matmul %44, %46, %cst_55 {dimension_numbers = #tpu.dot_dimension_numbers<[1], [0], [0], [1], [0, 0, 1, 1], [], []>} : vector<256x4xf32>, vector<4x8xf32>, vector<256x8xf32> -> vector<256x8xf32>
    %48 = arith.addf %42, %47 : vector<256x8xf32>
    %c0_56 = arith.constant 0 : index
    %c2_57 = arith.constant 2 : index
    %c2_58 = arith.constant 2 : index
    %c0_59 = arith.constant 0 : index
    %49 = vector.load %arg1[%c0_56, %c2_57, %c2_58, %c0_59] : memref<1x18x18x4xf32, #tpu.memory_space<vmem>>, vector<1x16x16x4xf32>
    %50 = vector.shape_cast %49 : vector<1x16x16x4xf32> to vector<256x4xf32>
    %c8 = arith.constant 8 : index
    %c0_60 = arith.constant 0 : index
    %c0_61 = arith.constant 0 : index
    %51 = vector.load %arg2[%c8, %c0_60, %c0_61] : memref<9x4x8xf32, #tpu.memory_space<vmem>>, vector<1x4x8xf32>
    %52 = vector.shape_cast %51 : vector<1x4x8xf32> to vector<4x8xf32>
    %cst_62 = arith.constant dense<0.000000e+00> : vector<256x8xf32>
    %53 = tpu.matmul %50, %52, %cst_62 {dimension_numbers = #tpu.dot_dimension_numbers<[1], [0], [0], [1], [0, 0, 1, 1], [], []>} : vector<256x4xf32>, vector<4x8xf32>, vector<256x8xf32> -> vector<256x8xf32>
    %54 = arith.addf %48, %53 : vector<256x8xf32>
    %cst_63 = arith.constant dense<0.000000e+00> : vector<8xf32>
    %55 = vector.multi_reduction <add>, %54, %cst_63 [0] : vector<256x8xf32> to vector<8xf32>
    %56 = vector.shape_cast %55 : vector<8xf32> to vector<1x8xf32>
    %57 = arith.mulf %54, %54 : vector<256x8xf32>
    %cst_64 = arith.constant dense<0.000000e+00> : vector<8xf32>
    %58 = vector.multi_reduction <add>, %57, %cst_64 [0] : vector<256x8xf32> to vector<8xf32>
    %59 = vector.shape_cast %58 : vector<8xf32> to vector<1x8xf32>
    %60 = vector.shape_cast %56 : vector<1x8xf32> to vector<1x1x8xf32>
    %c0_65 = arith.constant 0 : index
    %c0_66 = arith.constant 0 : index
    %c0_67 = arith.constant 0 : index
    %61 = vector.load %arg3[%c0_65, %c0_66, %c0_67] : memref<1x2x8xf32, #tpu.memory_space<vmem>>, vector<1x1x8xf32>
    tpu.vector_store %arg3[%c0_65, %c0_66, %c0_67], %60 {strides = array<i32>} : memref<1x2x8xf32, #tpu.memory_space<vmem>>, vector<1x1x8xf32>,
    %62 = vector.shape_cast %59 : vector<1x8xf32> to vector<1x1x8xf32>
    %c0_68 = arith.constant 0 : index
    %c1_69 = arith.constant 1 : index
    %c0_70 = arith.constant 0 : index
    %63 = vector.load %arg3[%c0_68, %c1_69, %c0_70] : memref<1x2x8xf32, #tpu.memory_space<vmem>>, vector<1x1x8xf32>
    tpu.vector_store %arg3[%c0_68, %c1_69, %c0_70], %62 {strides = array<i32>} : memref<1x2x8xf32, #tpu.memory_space<vmem>>, vector<1x1x8xf32>,
    return
  }
  func.func @transform_0(%arg0: i32) -> (i32, i32, i32, i32) {
    %c0_i32 = arith.constant 0 : i32
    %c0_i32_0 = arith.constant 0 : i32
    %c0_i32_1 = arith.constant 0 : i32
    %c0_i32_2 = arith.constant 0 : i32
    return %arg0, %c0_i32, %c0_i32_0, %c0_i32_1 : i32, i32, i32, i32
  }
  func.func @transform_1(%arg0: i32) -> (i32, i32, i32) {
    %c0_i32 = arith.constant 0 : i32
    %c0_i32_0 = arith.constant 0 : i32
    %c0_i32_1 = arith.constant 0 : i32
    %c0_i32_2 = arith.constant 0 : i32
    return %c0_i32, %c0_i32_0, %c0_i32_1 : i32, i32, i32
  }
  func.func @transform_2(%arg0: i32) -> (i32, i32, i32) {
    %c0_i32 = arith.constant 0 : i32
    %c0_i32_0 = arith.constant 0 : i32
    %c0_i32_1 = arith.constant 0 : i32
    return %arg0, %c0_i32, %c0_i32_0 : i32, i32, i32
  }
}

</mosaic_0001>

<bundles_post_ra>
// kernel: tpu_custom_call.1
= control target key start
LH: loop header
LB: loop body
LE: loop exit
PB: predicated region body
PF: predicated region fallthrough
CT: control target
= control target key end

     0   :  { %7 = vsyncpa [#allocation3], 0  ;;  %s6579_s0 = inlined_call_operand.vmem [shape: f32[2,18,18,4], index: 0, kind: input, shape index: {}]   ;;  %s6580_s1 = inlined_call_operand.vmem [shape: f32[9,4,8], index: 1, kind: input, shape index: {}]   ;;  %s6581_s2 = inlined_call_operand.hbm [shape: f32[2,2,8], index: 2, kind: output, shape index: {}]  }
   0x1   :  { %9 = vsyncpa [#allocation3 + $0x1], 0  ;;  %s5470_s9 = smov 0   ;;  %s5472_s10 = smov 0  }
   0x2   :  { %s5474_s11 = smov 0   ;;  %s5476_s12 = smov 0  }
   0x3 LB: > { %s5491_s13 = sadd.s32 4294967295, %s5452_s12   ;;  %s3838_s14 = sadd.s32 4294967294, %s5452_s12   ;;  %s5452_s12 = sphi %s5476_s12, %s6696_s12   ;;  %s5448_s11 = sphi %s5474_s11, %s6695_s11   ;;  %s5444_s10 = sphi %s5472_s10, %s6694_s10   ;;  %s5440_s9 = sphi %s5470_s9, %s6693_s9  }
   0x4   : > { %s5495_s15 = sadd.s32 1, %s5452_s12   ;;  %s69_s16 = sadd.s32 1, %s5448_s11 }
   0x5   : > { %s66_s17 = ssub.s32 %s5452_s12, %s5495_s15  ;;  %p79_p0 = scmp.ne.s32.totalorder %s5448_s11, %s5444_s10 }
   0x6   : > { %p67_p1 = scmp.eq.s32.totalorder %s66_s17, 0  ;;  %p80_p2 = scmp.eq.s32.totalorder %s5491_s13, 1 }
   0x7   : > { %p85_p3 = scmp.ne.s32.totalorder %s5444_s10, %s5440_s9  ;;  %p86_p4 = scmp.eq.s32.totalorder %s3838_s14, 1 }
   0x8   : > { %s5506_s18 = scalar_select %p67_p1, %s5448_s11, %s69_s16  }
   0x9   : > { %p5508_p5 = por %p80_p2, %p79_p0  ;;  %p5512_p6 = por %p86_p4, %p85_p3 }
   0xa   : > { %p3841_p7 = scmp.ge.s32.totalorder %s5452_s12, 1  ;;  %p115_p8 = scmp.lt.s32.totalorder %s5452_s12, 3 }
   0xc   : > { %p116_p9 = pnand %p3841_p7, %p115_p8 }
   0xe   : > { %119 = sbr.rel (%p116_p9) target bundleno = 562 (0x232), region = 28 }
  0x15   : > { %v3844_v0 = vld [vmem:[%s6580_s1 + $0x4] sm:$0xf]  ;;  %vm306_vm0 = vcmask 1043456   ;;  %v5524_v1 = vld [vmem:[%s6580_s1 + $0x10] sm:$0xf]  ;;  %p137_p10 = scmp.lt.s32.totalorder %s5491_s13, 1 }
  0x16   : > { %4642 = vmatprep.subr.msk.mxu1 %vm306_vm0, %v3844_v0  ;;  %4842 = vmatprep.subr.msk.mxu0 %vm306_vm0, %v5524_v1  ;;  %v174_v2 = vld [vmem:[%s6580_s1] sm:$0xf]  ;;  %v4109_v3 = vld [vmem:[%s6580_s1 + $0x14] sm:$0xf]  ;;  %vm209_vm1 = vcmask 31744   ;;  %vm3591_vm2 = vcmask 64512  }
  0x17   : > { %4643 = vmatpush3.msk.msra.mxu1 %vm306_vm0, %v3844_v0  ;;  %4843 = vmatpush3.msk.msra.mxu0 %vm306_vm0, %v5524_v1  ;;  %s138_s29 = scalar_select %p137_p10, %s5491_s13, 1  ;;  %v4175_v9 = vld [vmem:[%s6580_s1 + $0x18] sm:$0xf]  ;;  %v5564_v10 = vld [vmem:[%s6580_s1 + $0x8] sm:$0xf]  ;;  %vm3762_vm3 = vcmask 57344  }
  0x18   : > { %4692 = vmatprep.subr.msk.mxu1 %vm306_vm0, %v174_v2  ;;  %4892 = vmatprep.subr.msk.mxu0 %vm306_vm0, %v4109_v3  ;;  %v5683_v28 = vld [vmem:[%s6580_s1 + $0x1c] sm:$0xf]  ;;  %v5846_v61 = vld [vmem:[%s6580_s1 + $0xc] sm:$0xf]  ;;  %s134_s25 = sand.u32 1, %s5444_s10   ;;  %s4342_s27 = sshll.u32 %s5491_s13, 5 }
  0x19   : > { %s5350_s30 = smul.u32 432, %s138_s29  ;;  %s3842_s26 = sshll.u32 %s134_s25, 1 }
  0x1a   : > { %s136_s28 = scalar_lea.vmem [#allocation2], %s3842_s26  ;;  %s6537_s4 = scalar_lea.hbm %s6581_s2, %s4342_s27 }
  0x1b   : > { %s5545_s5 = scalar_lea.vmem %s6579_s0, %s5350_s30  ;;  %s3779_s29 = sshll.u32 %s136_s28, 4  ;;  %s6539_s29 = int_to_ptr.vmem [resolvable:$true] %s3779_s29 }
  0x1c   : > { %v175_v4 = vld [vmem:[%s5545_s5 + $0x1] sm:$0xff]  ;;  %v4011_v5 = vld [vmem:[%s5545_s5 + $0x19] sm:$0xff]  ;;  %v176_v6 = vld [vmem:[%s5545_s5 + $0x9] sm:$0xff]  ;;  %s5390_s6 = scalar_lea.vmem %s6539_s29, 32  ;;  %s5454_s13 = smov [#allocation2]  }
  0x1d   : > { %4644 = vmatprep.mubr.msk.f32.mxu1 %vm209_vm1, %v175_v4  ;;  %4844 = vmatprep.mubr.msk.f32.mxu0 %vm209_vm1, %v4011_v5  ;;  %v4012_v7 = vld [vmem:[%s5545_s5 + $0x21] sm:$0xff]  ;;  %v5554_v8 = vld [vmem:[%s5545_s5 + $0x31] sm:$0xff]  ;;  %v5569_v11 = vld [vmem:[%s5545_s5 + $0x39] sm:$0xff]  ;;  %p5391_p11 = scmp.ne.s32.totalorder %s6539_s29, %s5390_s6  ;;  %s5394_s7 = sshll.u32 %s5454_s13, 4  ;;  %s5395_s7 = int_to_ptr.vmem [resolvable:$false] %s5394_s7 }
  0x1e   : > { %4645 = vmatmul.mubr.msk.f32.vlgmr.msra.gmra.mrb[0].mxu1 %vm209_vm1, %v176_v6  ;;  %4845 = vmatmul.mubr.msk.f32.vlgmr.msra.gmra.mrb[0].mxu0 %vm209_vm1, %v4012_v7  ;;  %v5575_v12 = vld [vmem:[%s5545_s5 + $0x49] sm:$0xff]  ;;  %v5588_v13 = vld [vmem:[%s5545_s5 + $0x51] sm:$0xff]  ;;  %v5591_v14 = vld [vmem:[%s5545_s5 + $0x61] sm:$0xff]  ;;  %s5396_s8 = scalar_lea.vmem %s5395_s7, 64  ;;  %p5397_p0 = scmp.lt.s32.totalorder %s6539_s29, %s5395_s7 }
  0x1f   : > { %4693 = vmatpush3.msk.msra.mxu1 %vm306_vm0, %v174_v2  ;;  %4893 = vmatpush3.msk.msra.mxu0 %vm306_vm0, %v4109_v3  ;;  %v5602_v15 = vld [vmem:[%s5545_s5 + $0x69] sm:$0xff]  ;;  %v5605_v16 = vld [vmem:[%s5545_s5 + $0x79] sm:$0xff]  ;;  %v5616_v17 = vld [vmem:[%s5545_s5 + $0x81] sm:$0xff]  ;;  %p5392_p12 = pnand %p5391_p11, %p5508_p5  ;;  %p5398_p1 = scmp.lt.s32.totalorder %s5396_s8, %s5390_s6 }
  0x20   : > { %4647 = vmatprep.mubr.msk.f32.mxu1 %vm209_vm1, %v4011_v5  ;;  %4847 = vmatprep.mubr.msk.f32.mxu0 %vm209_vm1, %v5554_v8  ;;  %v5619_v18 = vld [vmem:[%s5545_s5 + $0x91] sm:$0xff]  ;;  %v5630_v19 = vld [vmem:[%s5545_s5 + $0x99] sm:$0xff]  ;;  %v5633_v20 = vld [vmem:[%s5545_s5 + $0xa9] sm:$0xff] }
  0x21   : > { %4942 = vmatprep.subr.msk.mxu0 %vm306_vm0, %v4175_v9  ;;  %4742 = vmatprep.subr.msk.mxu1 %vm306_vm0, %v5564_v10  ;;  %v5644_v21 = vld [vmem:[%s5545_s5 + $0xb1] sm:$0xff]  ;;  %v5647_v22 = vld [vmem:[%s5545_s5 + $0xc1] sm:$0xff]  ;;  %v5658_v23 = vld [vmem:[%s5545_s5 + $0xc9] sm:$0xff]  ;;  %p5393_p13 = pneg %p5392_p12  ;;  %p5399_p2 = por %p5398_p1, %p5397_p0 }
  0x22   : > { %4648 = vmatmul.mubr.msk.f32.gmra.mrb[2].mxu1 %vm209_vm1, %v4012_v7  ;;  %4848 = vmatmul.mubr.msk.f32.gmra.mrb[2].mxu0 %vm209_vm1, %v5569_v11  ;;  %v5661_v24 = vld [vmem:[%s5545_s5 + $0x1a] sm:$0xff]  ;;  %v5672_v25 = vld [vmem:[%s5545_s5 + $0x22] sm:$0xff]  ;;  %v5678_v27 = vld [vmem:[%s5545_s5 + $0x32] sm:$0xff] }
  0x23   : > { %4650 = vmatprep.mubr.msk.f32.mxu1 %vm209_vm1, %v5554_v8  ;;  %4850 = vmatprep.mubr.msk.f32.mxu0 %vm209_vm1, %v5575_v12  ;;  %v5675_v26 = vld [vmem:[%s5545_s5 + $0xd9] sm:$0xff]  ;;  %v5693_v29 = vld [vmem:[%s5545_s5 + $0xe1] sm:$0xff]  ;;  %v5701_v31 = vld [vmem:[%s5545_s5 + $0xf1] sm:$0xff]  ;;  %p5400_p3 = pnand %p5399_p2, %p5393_p13 }
  0x24   : > { %6629 = vst [vmem:[#allocation5_spill] sm:$0xff] %v5693_v29  ;;  %v5696_v30 = vld [vmem:[%s5545_s5 + $0x3a] sm:$0xff]  ;;  %6630 = vst [vmem:[#allocation6_spill] sm:$0xff] %v5701_v31  ;;  %v5704_v32 = vld [vmem:[%s5545_s5 + $0x4a] sm:$0xff] }
  0x25   : > { %v5717_v33 = vld [vmem:[%s5545_s5 + $0xf9] sm:$0xff]  ;;  %v5723_v35 = vld [vmem:[%s5545_s5 + $0x109] sm:$0xff]  ;;  %v5737_v37 = vld [vmem:[%s5545_s5 + $0x111] sm:$0xff] }
  0x26   : > { %4651 = vmatmul.mubr.msk.f32.gmra.mrb[4].mxu1 %vm209_vm1, %v5569_v11  ;;  %4851 = vmatmul.mubr.msk.f32.gmra.mrb[4].mxu0 %vm209_vm1, %v5588_v13  ;;  %6631 = vst [vmem:[#allocation7_spill] sm:$0xff] %v5717_v33  ;;  %v5720_v34 = vld [vmem:[%s5545_s5 + $0x52] sm:$0xff]  ;;  %6632 = vst [vmem:[#allocation8_spill] sm:$0xff] %v5723_v35  ;;  %v5726_v36 = vld [vmem:[%s5545_s5 + $0x62] sm:$0xff] }
  0x27   : > { %4653 = vmatprep.mubr.msk.f32.mxu1 %vm209_vm1, %v5575_v12  ;;  %4853 = vmatprep.mubr.msk.f32.mxu0 %vm209_vm1, %v5591_v14  ;;  %6633 = vst [vmem:[#allocation9_spill] sm:$0xff] %v5737_v37  ;;  %v5740_v38 = vld [vmem:[%s5545_s5 + $0x6a] sm:$0xff]  ;;  %v5743_v39 = vld [vmem:[%s5545_s5 + $0x121] sm:$0xff]  ;;  %v5763_v43 = vld [vmem:[%s5545_s5 + $0x139] sm:$0xff] }
  0x28   : > { %6634 = vst [vmem:[#allocation10_spill] sm:$0xff] %v5743_v39  ;;  %v5746_v40 = vld [vmem:[%s5545_s5 + $0x7a] sm:$0xff]  ;;  %v5757_v41 = vld [vmem:[%s5545_s5 + $0x129] sm:$0xff]  ;;  %6636 = vst [vmem:[#allocation12_spill] sm:$0xff] %v5763_v43 }
  0x29   : > { %6635 = vst [vmem:[#allocation11_spill] sm:$0xff] %v5757_v41  ;;  %v5760_v42 = vld [vmem:[%s5545_s5 + $0x82] sm:$0xff]  ;;  %v5766_v44 = vld [vmem:[%s5545_s5 + $0x92] sm:$0xff]  ;;  %v5780_v46 = vld [vmem:[%s5545_s5 + $0x9a] sm:$0xff] }
  0x2a   : > { %4654 = vmatmul.mubr.msk.f32.gmra.mrb[6].mxu1 %vm209_vm1, %v5588_v13  ;;  %4854 = vmatmul.mubr.msk.f32.gmra.mrb[6].mxu0 %vm209_vm1, %v5602_v15  ;;  %v5777_v45 = vld [vmem:[%s5545_s5 + $0x141] sm:$0xff]  ;;  %v5783_v47 = vld [vmem:[%s5545_s5 + $0x151] sm:$0xff]  ;;  %v5797_v49 = vld [vmem:[%s5545_s5 + $0x159] sm:$0xff] }
  0x2b   : > { %4656 = vmatprep.mubr.msk.f32.mxu1 %vm209_vm1, %v5591_v14  ;;  %4856 = vmatprep.mubr.msk.f32.mxu0 %vm209_vm1, %v5605_v16  ;;  %6637 = vst [vmem:[#allocation13_spill] sm:$0xff] %v5777_v45  ;;  %6638 = vst [vmem:[#allocation14_spill] sm:$0xff] %v5783_v47  ;;  %v5786_v48 = vld [vmem:[%s5545_s5 + $0xaa] sm:$0xff]  ;;  %v5800_v50 = vld [vmem:[%s5545_s5 + $0xb2] sm:$0xff] }
  0x2c   : > { %6639 = vst [vmem:[#allocation15_spill] sm:$0xff] %v5797_v49  ;;  %v5803_v51 = vld [vmem:[%s5545_s5 + $0x169] sm:$0xff]  ;;  %v5817_v53 = vld [vmem:[%s5545_s5 + $0x171] sm:$0xff]  ;;  %v142_v55 = vld [vmem:[%s5545_s5] sm:$0xff] }
  0x2d   : > { %6640 = vst [vmem:[#allocation16_spill] sm:$0xff] %v5803_v51  ;;  %v5806_v52 = vld [vmem:[%s5545_s5 + $0xc2] sm:$0xff]  ;;  %6641 = vst [vmem:[#allocation17_spill] sm:$0xff] %v5817_v53  ;;  %v5820_v54 = vld [vmem:[%s5545_s5 + $0xca] sm:$0xff] }
  0x2e   : > { %4657 = vmatmul.mubr.msk.f32.gmra.mrb[8].mxu1 %vm209_vm1, %v5602_v15  ;;  %4857 = vmatmul.mubr.msk.f32.gmra.mrb[8].mxu0 %vm209_vm1, %v5616_v17  ;;  %v5824_v56 = vld [vmem:[%s5545_s5 + $0xda] sm:$0xff]  ;;  %v143_v57 = vld [vmem:[%s5545_s5 + $0x8] sm:$0xff]  ;;  %v5841_v60 = vld [vmem:[%s5545_s5 + $0xf2] sm:$0xff] }
  0x2f   : > { %4659 = vmatprep.mubr.msk.f32.mxu1 %vm209_vm1, %v5605_v16  ;;  %4859 = vmatprep.mubr.msk.f32.mxu0 %vm209_vm1, %v5619_v18  ;;  %v5835_v58 = vld [vmem:[%s5545_s5 + $0xe2] sm:$0xff]  ;;  %v5838_v59 = vld [vmem:[%s5545_s5 + $0x18] sm:$0xff]  ;;  %v5864_v0 = vld [vmem:[%s5545_s5 + $0x30] sm:$0xff] }
  0x30   : > { %6642 = vst [vmem:[#allocation18_spill] sm:$0xff] %v5838_v59  ;;  %v5856_v62 = vld [vmem:[%s5545_s5 + $0x20] sm:$0xff]  ;;  %6644 = vst [vmem:[#allocation20_spill] sm:$0xff] %v5864_v0  ;;  %v5867_v2 = vld [vmem:[%s5545_s5 + $0x10a] sm:$0xff] }
  0x31   : > { %6643 = vst [vmem:[#allocation19_spill] sm:$0xff] %v5856_v62  ;;  %v5859_v63 = vld [vmem:[%s5545_s5 + $0xfa] sm:$0xff]  ;;  %v5883_v4 = vld [vmem:[%s5545_s5 + $0x112] sm:$0xff]  ;;  %v5886_v5 = vld [vmem:[%s5545_s5 + $0x48] sm:$0xff] }
  0x32   : > { %4660 = vmatmul.mubr.msk.f32.gmra.mrb[10].mxu1 %vm209_vm1, %v5616_v17  ;;  %4860 = vmatmul.mubr.msk.f32.gmra.mrb[10].mxu0 %vm209_vm1, %v5630_v19  ;;  %v5880_v3 = vld [vmem:[%s5545_s5 + $0x38] sm:$0xff]  ;;  %6646 = vst [vmem:[#allocation22_spill] sm:$0xff] %v5886_v5  ;;  %v5889_v6 = vld [vmem:[%s5545_s5 + $0x122] sm:$0xff]  ;;  %v5900_v7 = vld [vmem:[%s5545_s5 + $0x50] sm:$0xff] }
  0x33   : > { %4662 = vmatprep.mubr.msk.f32.mxu1 %vm209_vm1, %v5619_v18  ;;  %4862 = vmatprep.mubr.msk.f32.mxu0 %vm209_vm1, %v5633_v20  ;;  %6645 = vst [vmem:[#allocation21_spill] sm:$0xff] %v5880_v3  ;;  %6647 = vst [vmem:[#allocation23_spill] sm:$0xff] %v5900_v7 }
  0x36   : > { %4663 = vmatmul.mubr.msk.f32.gmra.mrb[12].mxu1 %vm209_vm1, %v5630_v19  ;;  %4863 = vmatmul.mubr.msk.f32.gmra.mrb[12].mxu0 %vm209_vm1, %v5644_v21 }
  0x37   : > { %4665 = vmatprep.mubr.msk.f32.mxu1 %vm209_vm1, %v5633_v20  ;;  %4865 = vmatprep.mubr.msk.f32.mxu0 %vm209_vm1, %v5647_v22 }
  0x3a   : > { %4666 = vmatmul.mubr.msk.f32.gmra.mrb[14].mxu1 %vm209_vm1, %v5644_v21  ;;  %4866 = vmatmul.mubr.msk.f32.gmra.mrb[14].mxu0 %vm209_vm1, %v5658_v23 }
  0x3b   : > { %4668 = vmatprep.mubr.msk.f32.mxu1 %vm209_vm1, %v5647_v22  ;;  %4894 = vmatprep.mubr.msk.f32.mxu0 %vm209_vm1, %v5661_v24 }
  0x3e   : > { %4669 = vmatmul.mubr.msk.f32.gmra.mrb[16].mxu1 %vm209_vm1, %v5658_v23  ;;  %4895 = vmatmul.mubr.msk.f32.vlgmr.msra.gmra.mrb[0].mxu0 %vm209_vm1, %v5672_v25 }
  0x3f   : > { %4943 = vmatpush3.msk.msra.mxu0 %vm306_vm0, %v4175_v9  ;;  %4671 = vmatprep.mubr.msk.f32.mxu1 %vm209_vm1, %v5675_v26  ;;  %v5903_v9 = vld [vmem:[%s5545_s5 + $0x12a] sm:$0xff] }
  0x40   : > { %4897 = vmatprep.mubr.msk.f32.mxu0 %vm209_vm1, %v5678_v27  ;;  %4992 = vmatprep.subr.msk.mxu0 %vm306_vm0, %v5683_v28 }
  0x42   : > { %4672 = vmatmul.mubr.msk.f32.gmra.mrb[18].mxu1 %vm209_vm1, %v5693_v29  ;;  %4898 = vmatmul.mubr.msk.f32.gmra.mrb[2].mxu0 %vm209_vm1, %v5696_v30  ;;  %v6000_v29 = vld [vmem:[%s5545_s5 + $0xd8] sm:$0xff] }
  0x43   : > { %4674 = vmatprep.mubr.msk.f32.mxu1 %vm209_vm1, %v5701_v31  ;;  %4900 = vmatprep.mubr.msk.f32.mxu0 %vm209_vm1, %v5704_v32  ;;  %v5983_v31 = vld [vmem:[%s5545_s5 + $0x18a] sm:$0xff] }
  0x44   : > { %6658 = vst [vmem:[#allocation34_spill] sm:$0xff] %v5983_v31 }
  0x46   : > { %4675 = vmatmul.mubr.msk.f32.gmra.mrb[20].mxu1 %vm209_vm1, %v5717_v33  ;;  %4901 = vmatmul.mubr.msk.f32.gmra.mrb[4].mxu0 %vm209_vm1, %v5720_v34  ;;  %v5969_v33 = vld [vmem:[%s5545_s5 + $0x182] sm:$0xff] }
  0x47   : > { %4677 = vmatprep.mubr.msk.f32.mxu1 %vm209_vm1, %v5723_v35  ;;  %4903 = vmatprep.mubr.msk.f32.mxu0 %vm209_vm1, %v5726_v36  ;;  %v5966_v35 = vld [vmem:[%s5545_s5 + $0xa8] sm:$0xff]  ;;  %6656 = vst [vmem:[#allocation32_spill] sm:$0xff] %v5969_v33 }
  0x48   : > { %6655 = vst [vmem:[#allocation31_spill] sm:$0xff] %v5966_v35 }
  0x4a   : > { %4678 = vmatmul.mubr.msk.f32.gmra.mrb[22].mxu1 %vm209_vm1, %v5737_v37  ;;  %4904 = vmatmul.mubr.msk.f32.gmra.mrb[6].mxu0 %vm209_vm1, %v5740_v38  ;;  %v5963_v37 = vld [vmem:[%s5545_s5 + $0x172] sm:$0xff] }
  0x4b   : > { %4680 = vmatprep.mubr.msk.f32.mxu1 %vm209_vm1, %v5743_v39  ;;  %4906 = vmatprep.mubr.msk.f32.mxu0 %vm209_vm1, %v5746_v40  ;;  %v5960_v39 = vld [vmem:[%s5545_s5 + $0x98] sm:$0xff]  ;;  %6654 = vst [vmem:[#allocation30_spill] sm:$0xff] %v5963_v37 }
  0x4c   : > { %6653 = vst [vmem:[#allocation29_spill] sm:$0xff] %v5960_v39 }
  0x4e   : > { %4681 = vmatmul.mubr.msk.f32.gmra.mrb[24].mxu1 %vm209_vm1, %v5757_v41  ;;  %4907 = vmatmul.mubr.msk.f32.gmra.mrb[8].mxu0 %vm209_vm1, %v5760_v42  ;;  %v5949_v41 = vld [vmem:[%s5545_s5 + $0x16a] sm:$0xff] }
  0x4f   : > { %4683 = vmatprep.mubr.msk.f32.mxu1 %vm209_vm1, %v5763_v43  ;;  %4909 = vmatprep.mubr.msk.f32.mxu0 %vm209_vm1, %v5766_v44  ;;  %v5946_v43 = vld [vmem:[%s5545_s5 + $0x90] sm:$0xff] }
  0x50   : > { %6652 = vst [vmem:[#allocation28_spill] sm:$0xff] %v5946_v43 }
  0x52   : > { %4684 = vmatmul.mubr.msk.f32.gmra.mrb[26].mxu1 %vm209_vm1, %v5777_v45  ;;  %4910 = vmatmul.mubr.msk.f32.gmra.mrb[10].mxu0 %vm209_vm1, %v5780_v46  ;;  %v5943_v45 = vld [vmem:[%s5545_s5 + $0x15a] sm:$0xff] }
  0x53   : > { %4686 = vmatprep.mubr.msk.f32.mxu1 %vm209_vm1, %v5783_v47  ;;  %4912 = vmatprep.mubr.msk.f32.mxu0 %vm209_vm1, %v5786_v48  ;;  %v5940_v47 = vld [vmem:[%s5545_s5 + $0x80] sm:$0xff] }
  0x54   : > { %6651 = vst [vmem:[#allocation27_spill] sm:$0xff] %v5940_v47 }
  0x56   : > { %4687 = vmatmul.mubr.msk.f32.gmra.mrb[28].mxu1 %vm209_vm1, %v5797_v49  ;;  %4913 = vmatmul.mubr.msk.f32.gmra.mrb[12].mxu0 %vm209_vm1, %v5800_v50  ;;  %v5929_v49 = vld [vmem:[%s5545_s5 + $0x152] sm:$0xff] }
  0x57   : > { %4689 = vmatprep.mubr.msk.f32.mxu1 %vm209_vm1, %v5803_v51  ;;  %4915 = vmatprep.mubr.msk.f32.mxu0 %vm209_vm1, %v5806_v52  ;;  %v5926_v51 = vld [vmem:[%s5545_s5 + $0x78] sm:$0xff] }
  0x58   : > { %6650 = vst [vmem:[#allocation26_spill] sm:$0xff] %v5926_v51 }
  0x5a   : > { %4690 = vmatmul.mubr.msk.f32.gmra.mrb[30].mxu1 %vm209_vm1, %v5817_v53  ;;  %4916 = vmatmul.mubr.msk.f32.gmra.mrb[14].mxu0 %vm209_vm1, %v5820_v54  ;;  %v5923_v53 = vld [vmem:[%s5545_s5 + $0x142] sm:$0xff] }
  0x5b   : > { %4694 = vmatprep.mubr.msk.f32.mxu1 %vm209_vm1, %v142_v55  ;;  %4918 = vmatprep.mubr.msk.f32.mxu0 %vm209_vm1, %v5824_v56  ;;  %v5909_v55 = vld [vmem:[%s5545_s5 + $0x13a] sm:$0xff] }
  0x5e   : > { %4695 = vmatmul.mubr.msk.f32.vlgmr.msra.gmra.mrb[0].mxu1 %vm209_vm1, %v143_v57  ;;  %4919 = vmatmul.mubr.msk.f32.gmra.mrb[16].mxu0 %vm209_vm1, %v5835_v58  ;;  %v5920_v57 = vld [vmem:[%s5545_s5 + $0x68] sm:$0xff] }
  0x5f   : > { %4743 = vmatpush3.msk.msra.mxu1 %vm306_vm0, %v5564_v10  ;;  %4697 = vmatprep.mubr.msk.f32.mxu1 %vm209_vm1, %v5838_v59  ;;  %v5906_v10 = vld [vmem:[%s5545_s5 + $0x60] sm:$0xff]  ;;  %6649 = vst [vmem:[#allocation25_spill] sm:$0xff] %v5920_v57 }
  0x60   : > { %4921 = vmatprep.mubr.msk.f32.mxu0 %vm209_vm1, %v5841_v60  ;;  %4792 = vmatprep.subr.msk.mxu1 %vm306_vm0, %v5846_v61  ;;  %6648 = vst [vmem:[#allocation24_spill] sm:$0xff] %v5906_v10  ;;  %v5986_v59 = vld [vmem:[%s5545_s5 + $0xc0] sm:$0xff] }
  0x62   : > { %4698 = vmatmul.mubr.msk.f32.gmra.mrb[2].mxu1 %vm209_vm1, %v5856_v62  ;;  %4922 = vmatmul.mubr.msk.f32.gmra.mrb[18].mxu0 %vm209_vm1, %v5859_v63  ;;  %v5980_v62 = vld [vmem:[%s5545_s5 + $0xb0] sm:$0xff] }
  0x63   : > { %4700 = vmatprep.mubr.msk.f32.mxu1 %vm209_vm1, %v5864_v0  ;;  %4924 = vmatprep.mubr.msk.f32.mxu0 %vm209_vm1, %v5867_v2  ;;  %6657 = vst [vmem:[#allocation33_spill] sm:$0xff] %v5980_v62 }
  0x66   : > { %4701 = vmatmul.mubr.msk.f32.gmra.mrb[4].mxu1 %vm209_vm1, %v5880_v3  ;;  %4925 = vmatmul.mubr.msk.f32.gmra.mrb[20].mxu0 %vm209_vm1, %v5883_v4 }
  0x67   : > { %4703 = vmatprep.mubr.msk.f32.mxu1 %vm209_vm1, %v5886_v5  ;;  %4927 = vmatprep.mubr.msk.f32.mxu0 %vm209_vm1, %v5889_v6 }
  0x6a   : > { %4704 = vmatmul.mubr.msk.f32.gmra.mrb[6].mxu1 %vm209_vm1, %v5900_v7  ;;  %4928 = vmatmul.mubr.msk.f32.gmra.mrb[22].mxu0 %vm209_vm1, %v5903_v9 }
  0x6b   : > { %4706 = vmatprep.mubr.msk.f32.mxu1 %vm209_vm1, %v5906_v10  ;;  %4930 = vmatprep.mubr.msk.f32.mxu0 %vm209_vm1, %v5909_v55 }
  0x6e   : > { %4707 = vmatmul.mubr.msk.f32.gmra.mrb[8].mxu1 %vm209_vm1, %v5920_v57  ;;  %4931 = vmatmul.mubr.msk.f32.gmra.mrb[24].mxu0 %vm209_vm1, %v5923_v53 }
  0x6f   : > { %4709 = vmatprep.mubr.msk.f32.mxu1 %vm209_vm1, %v5926_v51  ;;  %4933 = vmatprep.mubr.msk.f32.mxu0 %vm209_vm1, %v5929_v49 }
  0x72   : > { %4710 = vmatmul.mubr.msk.f32.gmra.mrb[10].mxu1 %vm209_vm1, %v5940_v47  ;;  %4934 = vmatmul.mubr.msk.f32.gmra.mrb[26].mxu0 %vm209_vm1, %v5943_v45 }
  0x73   : > { %4712 = vmatprep.mubr.msk.f32.mxu1 %vm209_vm1, %v5946_v43  ;;  %4936 = vmatprep.mubr.msk.f32.mxu0 %vm209_vm1, %v5949_v41 }
  0x76   : > { %4713 = vmatmul.mubr.msk.f32.gmra.mrb[12].mxu1 %vm209_vm1, %v5960_v39  ;;  %4937 = vmatmul.mubr.msk.f32.gmra.mrb[28].mxu0 %vm209_vm1, %v5963_v37  ;;  %v6005_v37 = vld [vmem:[%s6580_s1 + $0x20] sm:$0xf] }
  0x77   : > { %4715 = vmatprep.mubr.msk.f32.mxu1 %vm209_vm1, %v5966_v35  ;;  %4939 = vmatprep.mubr.msk.f32.mxu0 %vm209_vm1, %v5969_v33  ;;  %v5997_v33 = vld [vmem:[%s5545_s5 + $0xc8] sm:$0xff] }
  0x78   : > { %6659 = vst [vmem:[#allocation35_spill] sm:$0xff] %v5997_v33 }
  0x7a   : > { %4716 = vmatmul.mubr.msk.f32.gmra.mrb[14].mxu1 %vm209_vm1, %v5980_v62  ;;  %4940 = vmatmul.mubr.msk.f32.gmra.mrb[30].mxu0 %vm209_vm1, %v5983_v31  ;;  %v6016_v31 = vld [vmem:[%s5545_s5 + $0xe0] sm:$0xff] }
  0x7b   : > { %4718 = vmatprep.mubr.msk.f32.mxu1 %vm209_vm1, %v5986_v59  ;;  %4944 = vmatprep.mubr.msk.f32.mxu0 %vm209_vm1, %v5864_v0  ;;  %v6021_v0 = vld [vmem:[%s5545_s5 + $0xf0] sm:$0xff] }
  0x7e   : > { %4719 = vmatmul.mubr.msk.f32.gmra.mrb[16].mxu1 %vm209_vm1, %v5997_v33  ;;  %4945 = vmatmul.mubr.msk.f32.vlgmr.msra.gmra.mrb[0].mxu0 %vm209_vm1, %v5880_v3  ;;  %v859_v3 = vld [vmem:[%s5545_s5 + $0x2] sm:$0xff] }
  0x7f   : > { %4993 = vmatpush3.msk.msra.mxu0 %vm306_vm0, %v5683_v28  ;;  %4721 = vmatprep.mubr.msk.f32.mxu1 %vm209_vm1, %v6000_v29  ;;  %v6034_v28 = vld [vmem:[%s5545_s5 + $0xf8] sm:$0xff] }
  0x80   : > { %4947 = vmatprep.mubr.msk.f32.mxu0 %vm209_vm1, %v5886_v5  ;;  %5042 = vmatprep.subr.msk.mxu0 %vm306_vm0, %v6005_v37  ;;  %v6037_v5 = vld [vmem:[%s5545_s5 + $0x108] sm:$0xff] }
  0x82   : > { %4722 = vmatmul.mubr.msk.f32.gmra.mrb[18].mxu1 %vm209_vm1, %v6016_v31  ;;  %4948 = vmatmul.mubr.msk.f32.gmra.mrb[2].mxu0 %vm209_vm1, %v5900_v7  ;;  %v6048_v7 = vld [vmem:[%s5545_s5 + $0x110] sm:$0xff] }
  0x83   : > { %4724 = vmatprep.mubr.msk.f32.mxu1 %vm209_vm1, %v6021_v0  ;;  %4950 = vmatprep.mubr.msk.f32.mxu0 %vm209_vm1, %v5906_v10  ;;  %v6051_v10 = vld [vmem:[%s5545_s5 + $0x120] sm:$0xff] }
  0x86   : > { %4725 = vmatmul.mubr.msk.f32.gmra.mrb[20].mxu1 %vm209_vm1, %v6034_v28  ;;  %4951 = vmatmul.mubr.msk.f32.gmra.mrb[4].mxu0 %vm209_vm1, %v5920_v57  ;;  %v6062_v57 = vld [vmem:[%s5545_s5 + $0x128] sm:$0xff] }
  0x87   : > { %4727 = vmatprep.mubr.msk.f32.mxu1 %vm209_vm1, %v6037_v5  ;;  %4953 = vmatprep.mubr.msk.f32.mxu0 %vm209_vm1, %v5926_v51  ;;  %v6065_v51 = vld [vmem:[%s5545_s5 + $0x138] sm:$0xff] }
  0x8a   : > { %4728 = vmatmul.mubr.msk.f32.gmra.mrb[22].mxu1 %vm209_vm1, %v6048_v7  ;;  %4954 = vmatmul.mubr.msk.f32.gmra.mrb[6].mxu0 %vm209_vm1, %v5940_v47  ;;  %v6076_v47 = vld [vmem:[%s5545_s5 + $0x140] sm:$0xff] }
  0x8b   : > { %4730 = vmatprep.mubr.msk.f32.mxu1 %vm209_vm1, %v6051_v10  ;;  %4956 = vmatprep.mubr.msk.f32.mxu0 %vm209_vm1, %v5946_v43  ;;  %v6079_v43 = vld [vmem:[%s5545_s5 + $0x150] sm:$0xff] }
  0x8e   : > { %4731 = vmatmul.mubr.msk.f32.gmra.mrb[24].mxu1 %vm209_vm1, %v6062_v57  ;;  %4957 = vmatmul.mubr.msk.f32.gmra.mrb[8].mxu0 %vm209_vm1, %v5960_v39  ;;  %v6090_v39 = vld [vmem:[%s5545_s5 + $0x158] sm:$0xff] }
  0x8f   : > { %4733 = vmatprep.mubr.msk.f32.mxu1 %vm209_vm1, %v6065_v51  ;;  %4959 = vmatprep.mubr.msk.f32.mxu0 %vm209_vm1, %v5966_v35  ;;  %v6093_v35 = vld [vmem:[%s5545_s5 + $0x168] sm:$0xff] }
  0x92   : > { %4734 = vmatmul.mubr.msk.f32.gmra.mrb[26].mxu1 %vm209_vm1, %v6076_v47  ;;  %4960 = vmatmul.mubr.msk.f32.gmra.mrb[10].mxu0 %vm209_vm1, %v5980_v62  ;;  %v6104_v62 = vld [vmem:[%s5545_s5 + $0x170] sm:$0xff] }
  0x93   : > { %4736 = vmatprep.mubr.msk.f32.mxu1 %vm209_vm1, %v6079_v43  ;;  %4962 = vmatprep.mubr.msk.f32.mxu0 %vm209_vm1, %v5986_v59 }
  0x96   : > { %4737 = vmatmul.mubr.msk.f32.gmra.mrb[28].mxu1 %vm209_vm1, %v6090_v39  ;;  %4963 = vmatmul.mubr.msk.f32.gmra.mrb[12].mxu0 %vm209_vm1, %v5997_v33  ;;  %v860_v33 = vld [vmem:[%s5545_s5 + $0xa] sm:$0xff] }
  0x97   : > { %4739 = vmatprep.mubr.msk.f32.mxu1 %vm209_vm1, %v6093_v35  ;;  %4965 = vmatprep.mubr.msk.f32.mxu0 %vm209_vm1, %v6000_v29 }
  0x9a   : > { %4740 = vmatmul.mubr.msk.f32.gmra.mrb[30].mxu1 %vm209_vm1, %v6104_v62  ;;  %4966 = vmatmul.mubr.msk.f32.gmra.mrb[14].mxu0 %vm209_vm1, %v6016_v31 }
  0x9b   : > { %4744 = vmatprep.mubr.msk.f32.mxu1 %vm209_vm1, %v859_v3  ;;  %4968 = vmatprep.mubr.msk.f32.mxu0 %vm209_vm1, %v6021_v0  ;;  %v6676_v3 = vld [vmem:[#allocation25_spill] sm:$0xff] }
  0x9e   : > { %4745 = vmatmul.mubr.msk.f32.vlgmr.msra.gmra.mrb[0].mxu1 %vm209_vm1, %v860_v33  ;;  %4969 = vmatmul.mubr.msk.f32.gmra.mrb[16].mxu0 %vm209_vm1, %v6034_v28  ;;  %v4173_v33 = vld [vmem:[%s5545_s5 + $0x198] sm:$0xff] }
  0x9f   : > { %4793 = vmatpush3.msk.msra.mxu1 %vm306_vm0, %v5846_v61  ;;  %4747 = vmatprep.mubr.msk.f32.mxu1 %vm209_vm1, %v5661_v24  ;;  %v6159_v24 = vld [vmem:[%s5545_s5 + $0x180] sm:$0xff] }
  0xa0   : > { %4971 = vmatprep.mubr.msk.f32.mxu0 %vm209_vm1, %v6037_v5  ;;  %5092 = vmatprep.subr.msk.mxu1 %vm306_vm0, %v5524_v1  ;;  %v4174_v61 = vld [vmem:[%s5545_s5 + $0x1a0] sm:$0xff] }
  0xa2   : > { %4748 = vmatmul.mubr.msk.f32.gmra.mrb[2].mxu1 %vm209_vm1, %v5672_v25  ;;  %4972 = vmatmul.mubr.msk.f32.gmra.mrb[18].mxu0 %vm209_vm1, %v6048_v7  ;;  %v6170_v25 = vld [vmem:[%s5545_s5 + $0x188] sm:$0xff] }
  0xa3   : > { %4750 = vmatprep.mubr.msk.f32.mxu1 %vm209_vm1, %v5678_v27  ;;  %4974 = vmatprep.mubr.msk.f32.mxu0 %vm209_vm1, %v6051_v10 }
  0xa6   : > { %4751 = vmatmul.mubr.msk.f32.gmra.mrb[4].mxu1 %vm209_vm1, %v5696_v30  ;;  %4975 = vmatmul.mubr.msk.f32.gmra.mrb[20].mxu0 %vm209_vm1, %v6062_v57 }
  0xa7   : > { %4753 = vmatprep.mubr.msk.f32.mxu1 %vm209_vm1, %v5704_v32  ;;  %4977 = vmatprep.mubr.msk.f32.mxu0 %vm209_vm1, %v6065_v51 }
  0xaa   : > { %4754 = vmatmul.mubr.msk.f32.gmra.mrb[6].mxu1 %vm209_vm1, %v5720_v34  ;;  %4978 = vmatmul.mubr.msk.f32.gmra.mrb[22].mxu0 %vm209_vm1, %v6076_v47 }
  0xab   : > { %4756 = vmatprep.mubr.msk.f32.mxu1 %vm209_vm1, %v5726_v36  ;;  %4980 = vmatprep.mubr.msk.f32.mxu0 %vm209_vm1, %v6079_v43 }
  0xae   : > { %4757 = vmatmul.mubr.msk.f32.gmra.mrb[8].mxu1 %vm209_vm1, %v5740_v38  ;;  %4981 = vmatmul.mubr.msk.f32.gmra.mrb[24].mxu0 %vm209_vm1, %v6090_v39 }
  0xaf   : > { %4759 = vmatprep.mubr.msk.f32.mxu1 %vm209_vm1, %v5746_v40  ;;  %4983 = vmatprep.mubr.msk.f32.mxu0 %vm209_vm1, %v6093_v35 }
  0xb2   : > { %4760 = vmatmul.mubr.msk.f32.gmra.mrb[10].mxu1 %vm209_vm1, %v5760_v42  ;;  %4984 = vmatmul.mubr.msk.f32.gmra.mrb[26].mxu0 %vm209_vm1, %v6104_v62 }
  0xb3   : > { %4762 = vmatprep.mubr.msk.f32.mxu1 %vm209_vm1, %v5766_v44  ;;  %4986 = vmatprep.mubr.msk.f32.mxu0 %vm209_vm1, %v6159_v24 }
  0xb6   : > { %4763 = vmatmul.mubr.msk.f32.gmra.mrb[12].mxu1 %vm209_vm1, %v5780_v46  ;;  %4987 = vmatmul.mubr.msk.f32.gmra.mrb[28].mxu0 %vm209_vm1, %v6170_v25 }
  0xb7   : > { %4765 = vmatprep.mubr.msk.f32.mxu1 %vm209_vm1, %v5786_v48  ;;  %4989 = vmatprep.mubr.msk.f32.mxu0 %vm209_vm1, %v4173_v33  ;;  %v6677_v33 = vld [vmem:[#allocation13_spill] sm:$0xff] }
  0xba   : > { %4766 = vmatmul.mubr.msk.f32.gmra.mrb[14].mxu1 %vm209_vm1, %v5800_v50  ;;  %4990 = vmatmul.mubr.msk.f32.gmra.mrb[30].mxu0 %vm209_vm1, %v4174_v61  ;;  %v6678_v61 = vld [vmem:[#allocation26_spill] sm:$0xff] }
  0xbb   : > { %4768 = vmatprep.mubr.msk.f32.mxu1 %vm209_vm1, %v5806_v52  ;;  %4994 = vmatprep.mubr.msk.f32.mxu0 %vm209_vm1, %v5554_v8  ;;  %v6660_v8 = vld [vmem:[#allocation30_spill] sm:$0xff] }
  0xbe   : > { %4769 = vmatmul.mubr.msk.f32.gmra.mrb[16].mxu1 %vm209_vm1, %v5820_v54  ;;  %4995 = vmatmul.mubr.msk.f32.vlgmr.msra.gmra.mrb[0].mxu0 %vm209_vm1, %v5569_v11  ;;  %v6661_v11 = vld [vmem:[#allocation5_spill] sm:$0xff] }
  0xbf   : > { %5043 = vmatpush3.msk.msra.mxu0 %vm306_vm0, %v6005_v37  ;;  %4771 = vmatprep.mubr.msk.f32.mxu1 %vm209_vm1, %v5824_v56  ;;  %v6675_v37 = vld [vmem:[#allocation12_spill] sm:$0xff] }
  0xc0   : > { %4997 = vmatprep.mubr.msk.f32.mxu0 %vm209_vm1, %v5575_v12  ;;  %v6662_v12 = vld [vmem:[#allocation18_spill] sm:$0xff] }
  0xc2   : > { %4772 = vmatmul.mubr.msk.f32.gmra.mrb[18].mxu1 %vm209_vm1, %v5835_v58  ;;  %4998 = vmatmul.mubr.msk.f32.gmra.mrb[2].mxu0 %vm209_vm1, %v5588_v13  ;;  %v6663_v13 = vld [vmem:[#allocation6_spill] sm:$0xff] }
  0xc3   : > { %4774 = vmatprep.mubr.msk.f32.mxu1 %vm209_vm1, %v5841_v60  ;;  %5000 = vmatprep.mubr.msk.f32.mxu0 %vm209_vm1, %v5591_v14  ;;  %v6664_v14 = vld [vmem:[#allocation19_spill] sm:$0xff] }
  0xc6   : > { %4775 = vmatmul.mubr.msk.f32.gmra.mrb[20].mxu1 %vm209_vm1, %v5859_v63  ;;  %5001 = vmatmul.mubr.msk.f32.gmra.mrb[4].mxu0 %vm209_vm1, %v5602_v15  ;;  %v6665_v15 = vld [vmem:[#allocation7_spill] sm:$0xff] }
  0xc7   : > { %4777 = vmatprep.mubr.msk.f32.mxu1 %vm209_vm1, %v5867_v2  ;;  %5003 = vmatprep.mubr.msk.f32.mxu0 %vm209_vm1, %v5605_v16  ;;  %v6666_v16 = vld [vmem:[#allocation20_spill] sm:$0xff] }
  0xca   : > { %4778 = vmatmul.mubr.msk.f32.gmra.mrb[22].mxu1 %vm209_vm1, %v5883_v4  ;;  %5004 = vmatmul.mubr.msk.f32.gmra.mrb[6].mxu0 %vm209_vm1, %v5616_v17  ;;  %v6667_v17 = vld [vmem:[#allocation8_spill] sm:$0xff] }
  0xcb   : > { %4780 = vmatprep.mubr.msk.f32.mxu1 %vm209_vm1, %v5889_v6  ;;  %5006 = vmatprep.mubr.msk.f32.mxu0 %vm209_vm1, %v5619_v18  ;;  %v6668_v18 = vld [vmem:[#allocation21_spill] sm:$0xff] }
  0xce   : > { %4781 = vmatmul.mubr.msk.f32.gmra.mrb[24].mxu1 %vm209_vm1, %v5903_v9  ;;  %5007 = vmatmul.mubr.msk.f32.gmra.mrb[8].mxu0 %vm209_vm1, %v5630_v19  ;;  %v6669_v19 = vld [vmem:[#allocation9_spill] sm:$0xff] }
  0xcf   : > { %4783 = vmatprep.mubr.msk.f32.mxu1 %vm209_vm1, %v5909_v55  ;;  %5009 = vmatprep.mubr.msk.f32.mxu0 %vm209_vm1, %v5633_v20  ;;  %v6670_v20 = vld [vmem:[#allocation22_spill] sm:$0xff] }
  0xd2   : > { %4784 = vmatmul.mubr.msk.f32.gmra.mrb[26].mxu1 %vm209_vm1, %v5923_v53  ;;  %5010 = vmatmul.mubr.msk.f32.gmra.mrb[10].mxu0 %vm209_vm1, %v5644_v21  ;;  %v6671_v21 = vld [vmem:[#allocation10_spill] sm:$0xff] }
  0xd3   : > { %4786 = vmatprep.mubr.msk.f32.mxu1 %vm209_vm1, %v5929_v49  ;;  %5012 = vmatprep.mubr.msk.f32.mxu0 %vm209_vm1, %v5647_v22  ;;  %v6673_v22 = vld [vmem:[#allocation11_spill] sm:$0xff] }
  0xd6   : > { %4787 = vmatmul.mubr.msk.f32.gmra.mrb[28].mxu1 %vm209_vm1, %v5943_v45  ;;  %5013 = vmatmul.mubr.msk.f32.gmra.mrb[12].mxu0 %vm209_vm1, %v5658_v23  ;;  %v6674_v23 = vld [vmem:[#allocation24_spill] sm:$0xff] }
  0xd7   : > { %4789 = vmatprep.mubr.msk.f32.mxu1 %vm209_vm1, %v5949_v41  ;;  %5015 = vmatprep.mubr.msk.f32.mxu0 %vm209_vm1, %v5675_v26 }
  0xda   : > { %4790 = vmatmul.mubr.msk.f32.gmra.mrb[30].mxu1 %vm209_vm1, %v6660_v8  ;;  %5016 = vmatmul.mubr.msk.f32.gmra.mrb[14].mxu0 %vm209_vm1, %v6661_v11  ;;  %v6687_v8 = vld [vmem:[#allocation33_spill] sm:$0xff] }
  0xdb   : > { %4794 = vmatprep.mubr.msk.f32.mxu1 %vm209_vm1, %v6662_v12  ;;  %5018 = vmatprep.mubr.msk.f32.mxu0 %vm209_vm1, %v6663_v13  ;;  %v6679_v12 = vld [vmem:[#allocation14_spill] sm:$0xff] }
  0xde   : > { %4795 = vmatmul.mubr.msk.f32.vlgmr.msra.gmra.mrb[0].mxu1 %vm209_vm1, %v6664_v14  ;;  %5019 = vmatmul.mubr.msk.f32.gmra.mrb[16].mxu0 %vm209_vm1, %v6665_v15  ;;  %v6680_v14 = vld [vmem:[#allocation27_spill] sm:$0xff] }
  0xdf   : > { %5093 = vmatpush3.msk.msra.mxu1 %vm306_vm0, %v5524_v1  ;;  %4797 = vmatprep.mubr.msk.f32.mxu1 %vm209_vm1, %v6666_v16  ;;  %v6672_v1 = vld [vmem:[#allocation23_spill] sm:$0xff] }
  0xe0   : > { %5021 = vmatprep.mubr.msk.f32.mxu0 %vm209_vm1, %v6667_v17  ;;  %v6681_v16 = vld [vmem:[#allocation15_spill] sm:$0xff] }
  0xe2   : > { %4798 = vmatmul.mubr.msk.f32.gmra.mrb[2].mxu1 %vm209_vm1, %v6668_v18  ;;  %5022 = vmatmul.mubr.msk.f32.gmra.mrb[18].mxu0 %vm209_vm1, %v6669_v19  ;;  %v6682_v18 = vld [vmem:[#allocation28_spill] sm:$0xff] }
  0xe3   : > { %4800 = vmatprep.mubr.msk.f32.mxu1 %vm209_vm1, %v6670_v20  ;;  %5024 = vmatprep.mubr.msk.f32.mxu0 %vm209_vm1, %v6671_v21  ;;  %v6683_v20 = vld [vmem:[#allocation16_spill] sm:$0xff] }
  0xe6   : > { %4801 = vmatmul.mubr.msk.f32.gmra.mrb[4].mxu1 %vm209_vm1, %v6672_v1  ;;  %5025 = vmatmul.mubr.msk.f32.gmra.mrb[20].mxu0 %vm209_vm1, %v6673_v22  ;;  %v6297_v1 = vld [vmem:[%s5545_s5 + $0x181] sm:$0xff] }
  0xe7   : > { %4803 = vmatprep.mubr.msk.f32.mxu1 %vm209_vm1, %v6674_v23  ;;  %5027 = vmatprep.mubr.msk.f32.mxu0 %vm209_vm1, %v6675_v37  ;;  %v6684_v23 = vld [vmem:[#allocation29_spill] sm:$0xff] }
  0xea   : > { %4804 = vmatmul.mubr.msk.f32.gmra.mrb[6].mxu1 %vm209_vm1, %v6676_v3  ;;  %5028 = vmatmul.mubr.msk.f32.gmra.mrb[22].mxu0 %vm209_vm1, %v6677_v33  ;;  %v6685_v3 = vld [vmem:[#allocation17_spill] sm:$0xff] }
  0xeb   : > { %4806 = vmatprep.mubr.msk.f32.mxu1 %vm209_vm1, %v6678_v61  ;;  %5030 = vmatprep.mubr.msk.f32.mxu0 %vm209_vm1, %v6679_v12  ;;  %v6686_v61 = vld [vmem:[#allocation31_spill] sm:$0xff] }
  0xee   : > { %4807 = vmatmul.mubr.msk.f32.gmra.mrb[8].mxu1 %vm209_vm1, %v6680_v14  ;;  %5031 = vmatmul.mubr.msk.f32.gmra.mrb[24].mxu0 %vm209_vm1, %v6681_v16  ;;  %v6308_v14 = vld [vmem:[%s5545_s5 + $0x189] sm:$0xff] }
  0xef   : > { %4809 = vmatprep.mubr.msk.f32.mxu1 %vm209_vm1, %v6682_v18  ;;  %5033 = vmatprep.mubr.msk.f32.mxu0 %vm209_vm1, %v6683_v20  ;;  %v4239_v18 = vld [vmem:[%s5545_s5 + $0x199] sm:$0xff] }
  0xf2   : > { %4810 = vmatmul.mubr.msk.f32.gmra.mrb[10].mxu1 %vm209_vm1, %v6684_v23  ;;  %5034 = vmatmul.mubr.msk.f32.gmra.mrb[26].mxu0 %vm209_vm1, %v6685_v3  ;;  %v4240_v23 = vld [vmem:[%s5545_s5 + $0x1a1] sm:$0xff]  ;;  %v6688_v3 = vld [vmem:[#allocation35_spill] sm:$0xff] }
  0xf3   : > { %4812 = vmatprep.mubr.msk.f32.mxu1 %vm209_vm1, %v6686_v61  ;;  %5036 = vmatprep.mubr.msk.f32.mxu0 %vm209_vm1, %v6297_v1 }
  0xf6   : > { %4813 = vmatmul.mubr.msk.f32.gmra.mrb[12].mxu1 %vm209_vm1, %v6687_v8  ;;  %5037 = vmatmul.mubr.msk.f32.gmra.mrb[28].mxu0 %vm209_vm1, %v6308_v14 }
  0xf7   : > { %4815 = vmatprep.mubr.msk.f32.mxu1 %vm209_vm1, %v5986_v59  ;;  %5039 = vmatprep.mubr.msk.f32.mxu0 %vm209_vm1, %v4239_v18 }
  0xfa   : > { %4816 = vmatmul.mubr.msk.f32.gmra.mrb[14].mxu1 %vm209_vm1, %v6688_v3  ;;  %5040 = vmatmul.mubr.msk.f32.gmra.mrb[30].mxu0 %vm209_vm1, %v4240_v23 }
  0xfb   : > { %4818 = vmatprep.mubr.msk.f32.mxu1 %vm209_vm1, %v6000_v29  ;;  %5044 = vmatprep.mubr.msk.f32.mxu0 %vm209_vm1, %v5678_v27  ;;  %v6690_v27 = vld [vmem:[#allocation32_spill] sm:$0xff] }
  0xfc   : > { %v4305_v29 = vld [vmem:[%s5545_s5 + $0x19a] sm:$0xff] }
  0xfe   : > { %4819 = vmatmul.mubr.msk.f32.gmra.mrb[16].mxu1 %vm209_vm1, %v6016_v31  ;;  %5045 = vmatmul.mubr.msk.f32.vlgmr.msra.gmra.mrb[0].mxu0 %vm209_vm1, %v5696_v30  ;;  %v6691_v30 = vld [vmem:[#allocation17_spill] sm:$0xff]  ;;  %v6692_v31 = vld [vmem:[#allocation34_spill] sm:$0xff] }
  0xff   : > { %4821 = vmatprep.mubr.msk.f32.mxu1 %vm209_vm1, %v6021_v0  ;;  %5047 = vmatprep.mubr.msk.f32.mxu0 %vm209_vm1, %v5704_v32  ;;  %v4306_v32 = vld [vmem:[%s5545_s5 + $0x1a2] sm:$0xff]  ;;  %s3766_s5 = scalar_lea.sflag [#allocation3], %s134_s25 }
 0x102   : > { %4822 = vmatmul.mubr.msk.f32.gmra.mrb[18].mxu1 %vm209_vm1, %v6034_v28  ;;  %5048 = vmatmul.mubr.msk.f32.gmra.mrb[2].mxu0 %vm209_vm1, %v5720_v34 }
 0x103   : > { %4824 = vmatprep.mubr.msk.f32.mxu1 %vm209_vm1, %v6037_v5  ;;  %5050 = vmatprep.mubr.msk.f32.mxu0 %vm209_vm1, %v5726_v36 }
 0x106   : > { %4825 = vmatmul.mubr.msk.f32.gmra.mrb[20].mxu1 %vm209_vm1, %v6048_v7  ;;  %5051 = vmatmul.mubr.msk.f32.gmra.mrb[4].mxu0 %vm209_vm1, %v5740_v38 }
 0x107   : > { %4827 = vmatprep.mubr.msk.f32.mxu1 %vm209_vm1, %v6051_v10  ;;  %5053 = vmatprep.mubr.msk.f32.mxu0 %vm209_vm1, %v5746_v40 }
 0x10a   : > { %4828 = vmatmul.mubr.msk.f32.gmra.mrb[22].mxu1 %vm209_vm1, %v6062_v57  ;;  %5054 = vmatmul.mubr.msk.f32.gmra.mrb[6].mxu0 %vm209_vm1, %v5760_v42 }
 0x10b   : > { %4830 = vmatprep.mubr.msk.f32.mxu1 %vm209_vm1, %v6065_v51  ;;  %5056 = vmatprep.mubr.msk.f32.mxu0 %vm209_vm1, %v5766_v44 }
 0x10e   : > { %4831 = vmatmul.mubr.msk.f32.gmra.mrb[24].mxu1 %vm209_vm1, %v6076_v47  ;;  %5057 = vmatmul.mubr.msk.f32.gmra.mrb[8].mxu0 %vm209_vm1, %v5780_v46 }
 0x10f   : > { %4833 = vmatprep.mubr.msk.f32.mxu1 %vm209_vm1, %v6079_v43  ;;  %5059 = vmatprep.mubr.msk.f32.mxu0 %vm209_vm1, %v5786_v48 }
 0x112   : > { %4834 = vmatmul.mubr.msk.f32.gmra.mrb[26].mxu1 %vm209_vm1, %v6090_v39  ;;  %5060 = vmatmul.mubr.msk.f32.gmra.mrb[10].mxu0 %vm209_vm1, %v5800_v50 }
 0x113   : > { %4836 = vmatprep.mubr.msk.f32.mxu1 %vm209_vm1, %v6093_v35  ;;  %5062 = vmatprep.mubr.msk.f32.mxu0 %vm209_vm1, %v5806_v52 }
 0x116   : > { %4837 = vmatmul.mubr.msk.f32.gmra.mrb[28].mxu1 %vm209_vm1, %v6104_v62  ;;  %5063 = vmatmul.mubr.msk.f32.gmra.mrb[12].mxu0 %vm209_vm1, %v5820_v54 }
 0x117   : > { %4839 = vmatprep.mubr.msk.f32.mxu1 %vm209_vm1, %v6159_v24  ;;  %5065 = vmatprep.mubr.msk.f32.mxu0 %vm209_vm1, %v5824_v56 }
 0x11a   : > { %4840 = vmatmul.mubr.msk.f32.gmra.mrb[30].mxu1 %vm209_vm1, %v6170_v25  ;;  %5066 = vmatmul.mubr.msk.f32.gmra.mrb[14].mxu0 %vm209_vm1, %v5835_v58 }
 0x11b   : > { %4868 = vmatprep.mubr.msk.f32.mxu1 %vm209_vm1, %v5675_v26  ;;  %5068 = vmatprep.mubr.msk.f32.mxu0 %vm209_vm1, %v5841_v60  ;;  %v6689_v26 = vld [vmem:[#allocation30_spill] sm:$0xff] }
 0x11e   : > { %4869 = vmatmul.mubr.msk.f32.vlgmr.msra.gmra.mrb[16].mxu1 %vm209_vm1, %v6661_v11  ;;  %5069 = vmatmul.mubr.msk.f32.gmra.mrb[16].mxu0 %vm209_vm1, %v5859_v63 }
 0x11f   : > { %4871 = vmatprep.mubr.msk.f32.mxu1 %vm209_vm1, %v6663_v13  ;;  %5071 = vmatprep.mubr.msk.f32.mxu0 %vm209_vm1, %v5867_v2 }
 0x122   : > { %4872 = vmatmul.mubr.msk.f32.gmra.mrb[18].mxu1 %vm209_vm1, %v6665_v15  ;;  %5072 = vmatmul.mubr.msk.f32.gmra.mrb[18].mxu0 %vm209_vm1, %v5883_v4 }
 0x123   : > { %4874 = vmatprep.mubr.msk.f32.mxu1 %vm209_vm1, %v6667_v17  ;;  %5074 = vmatprep.mubr.msk.f32.mxu0 %vm209_vm1, %v5889_v6 }
 0x126   : > { %4875 = vmatmul.mubr.msk.f32.gmra.mrb[20].mxu1 %vm209_vm1, %v6669_v19  ;;  %5075 = vmatmul.mubr.msk.f32.gmra.mrb[20].mxu0 %vm209_vm1, %v5903_v9 }
 0x127   : > { %4877 = vmatprep.mubr.msk.f32.mxu1 %vm209_vm1, %v6671_v21  ;;  %5077 = vmatprep.mubr.msk.f32.mxu0 %vm209_vm1, %v5909_v55 }
 0x12a   : > { %4878 = vmatmul.mubr.msk.f32.gmra.mrb[22].mxu1 %vm209_vm1, %v6673_v22  ;;  %5078 = vmatmul.mubr.msk.f32.gmra.mrb[22].mxu0 %vm209_vm1, %v5923_v53 }
 0x12b   : > { %4880 = vmatprep.mubr.msk.f32.mxu1 %vm209_vm1, %v6675_v37  ;;  %5080 = vmatprep.mubr.msk.f32.mxu0 %vm209_vm1, %v5929_v49 }
 0x12e   : > { %4881 = vmatmul.mubr.msk.f32.gmra.mrb[24].mxu1 %vm209_vm1, %v6677_v33  ;;  %5081 = vmatmul.mubr.msk.f32.gmra.mrb[24].mxu0 %vm209_vm1, %v5943_v45 }
 0x12f   : > { %4883 = vmatprep.mubr.msk.f32.mxu1 %vm209_vm1, %v6679_v12  ;;  %5083 = vmatprep.mubr.msk.f32.mxu0 %vm209_vm1, %v5949_v41 }
 0x132   : > { %4884 = vmatmul.mubr.msk.f32.gmra.mrb[26].mxu1 %vm209_vm1, %v6681_v16  ;;  %5084 = vmatmul.mubr.msk.f32.gmra.mrb[26].mxu0 %vm209_vm1, %v6689_v26 }
 0x133   : > { %4886 = vmatprep.mubr.msk.f32.mxu1 %vm209_vm1, %v6683_v20  ;;  %5086 = vmatprep.mubr.msk.f32.mxu0 %vm209_vm1, %v6690_v27 }
 0x136   : > { %4887 = vmatmul.mubr.msk.f32.gmra.mrb[28].mxu1 %vm209_vm1, %v6691_v30  ;;  %5087 = vmatmul.mubr.msk.f32.gmra.mrb[28].mxu0 %vm209_vm1, %v6692_v31 }
 0x137   : > { %4889 = vmatprep.mubr.msk.f32.mxu1 %vm209_vm1, %v6297_v1  ;;  %5089 = vmatprep.mubr.msk.f32.mxu0 %vm209_vm1, %v4305_v29 }
 0x13a   : > { %4890 = vmatmul.mubr.msk.f32.gmra.mrb[30].mxu1 %vm209_vm1, %v6308_v14  ;;  %5090 = vmatmul.mubr.msk.f32.gmra.mrb[30].mxu0 %vm209_vm1, %v4306_v32 }
 0x1b1   : > { %v4796_v34 = vpop.f32.mrb[0].mxu1 }
 0x1b2   : > { %v1449_v35 = vpop.f32.mrb[1].mxu1 }
 0x1b5   : > { %v4799_v36 = vpop.f32.mrb[2].mxu1 }
 0x1b6   : > { %v1459_v38 = vpop.f32.mrb[3].mxu1 }
 0x1b9   : > { %v4802_v39 = vpop.f32.mrb[4].mxu1 }
 0x1ba   : > { %v1469_v40 = vpop.f32.mrb[5].mxu1 }
 0x1bd   : > { %v4805_v41 = vpop.f32.mrb[6].mxu1 }
 0x1be   : > { %v1479_v42 = vpop.f32.mrb[7].mxu1 }
 0x1c1   : > { %v4808_v43 = vpop.f32.mrb[8].mxu1 }
 0x1c2   : > { %v1489_v44 = vpop.f32.mrb[9].mxu1 }
 0x1c5   : > { %v6450_v45 = vpop.f32.mrb[10].mxu1 }
 0x1c6   : > { %v6452_v46 = vpop.f32.mrb[11].mxu1 }
 0x1c9   : > { %v6454_v47 = vpop.f32.mrb[12].mxu1 }
 0x1ca   : > { %v6456_v48 = vpop.f32.mrb[13].mxu1 }
 0x1cd   : > { %v6458_v49 = vpop.f32.mrb[14].mxu1 }
 0x1ce   : > { %v6460_v50 = vpop.f32.mrb[15].mxu1 }
 0x1d1   : > { %v5046_v51 = vpop.f32.mrb[0].mxu0 }
 0x1d2   : > { %v5094_v52 = vadd.f32 %v5046_v51, %v4796_v34  ;;  %v3400_v53 = vpop.f32.mrb[1].mxu0 }
 0x1d3   : > { %v5095_v54 = vadd.f32 %v3400_v53, %v1449_v35 }
 0x1d4   : > { %v3593_v56 = vsel %vm3591_vm2, %v5094_v52, 0.0  ;;  %v3662_v58 = vmul.f32 %v5094_v52, %v5094_v52 }
 0x1d5   : > { %v3592_v59 = vsel %vm3591_vm2, %v5095_v54, 0.0  ;;  %v3661_v60 = vmul.f32 %v5095_v54, %v5095_v54  ;;  %v5049_v62 = vpop.f32.mrb[2].mxu0 }
 0x1d6   : > { %v3694_v63 = vsel %vm3591_vm2, %v3662_v58, 0.0  ;;  %v3594_v0 = vadd.f32 %v3593_v56, %v3592_v59  ;;  %v5096_v2 = vadd.f32 %v5049_v62, %v4799_v36  ;;  %v3410_v4 = vpop.f32.mrb[3].mxu0 }
 0x1d7   : > { %v3693_v5 = vsel %vm3591_vm2, %v3661_v60, 0.0  ;;  %v5097_v6 = vadd.f32 %v3410_v4, %v1459_v38 }
 0x1d8   : > { %v3695_v7 = vadd.f32 %v3694_v63, %v3693_v5  ;;  %v3664_v9 = vmul.f32 %v5096_v2, %v5096_v2  ;;  %v3597_v8 = vsel %vm3591_vm2, %v5096_v2, 0.0 }
 0x1d9   : > { %v3595_v10 = vsel %vm3591_vm2, %v5097_v6, 0.0  ;;  %v3663_v55 = vmul.f32 %v5097_v6, %v5097_v6  ;;  %v5052_v57 = vpop.f32.mrb[4].mxu0 }
 0x1da   : > { %v3596_v28 = vadd.f32 %v3595_v10, %v3594_v0  ;;  %v5098_v24 = vadd.f32 %v5052_v57, %v4802_v39  ;;  %v3420_v25 = vpop.f32.mrb[5].mxu0  ;;  %v3698_v19 = vsel %vm3591_vm2, %v3664_v9, 0.0 }
 0x1db   : > { %v3696_v11 = vsel %vm3591_vm2, %v3663_v55, 0.0  ;;  %v5099_v13 = vadd.f32 %v3420_v25, %v1469_v40 }
 0x1dc   : > { %v3697_v15 = vadd.f32 %v3696_v11, %v3695_v7  ;;  %v3598_v17 = vadd.f32 %v3597_v8, %v3596_v28  ;;  %v3666_v21 = vmul.f32 %v5098_v24, %v5098_v24  ;;  %v3601_v3 = vsel %vm3591_vm2, %v5098_v24, 0.0 }
 0x1dd   : > { %v3599_v22 = vsel %vm3591_vm2, %v5099_v13, 0.0  ;;  %v3665_v37 = vmul.f32 %v5099_v13, %v5099_v13  ;;  %v5055_v33 = vpop.f32.mrb[6].mxu0 }
 0x1de   : > { %v3600_v12 = vadd.f32 %v3599_v22, %v3598_v17  ;;  %v3699_v16 = vadd.f32 %v3698_v19, %v3697_v15  ;;  %v5100_v20 = vadd.f32 %v5055_v33, %v4805_v41  ;;  %v3430_v1 = vpop.f32.mrb[7].mxu0  ;;  %v3702_v26 = vsel %vm3591_vm2, %v3666_v21, 0.0 }
 0x1df   : > { %v3700_v61 = vsel %vm3591_vm2, %v3665_v37, 0.0  ;;  %v5101_v14 = vadd.f32 %v3430_v1, %v1479_v42 }
 0x1e0   : > { %v3701_v18 = vadd.f32 %v3700_v61, %v3699_v16  ;;  %v3602_v23 = vadd.f32 %v3601_v3, %v3600_v12  ;;  %v3668_v27 = vmul.f32 %v5100_v20, %v5100_v20  ;;  %v3605_v38 = vsel %vm3591_vm2, %v5100_v20, 0.0 }
 0x1e1   : > { %v3603_v29 = vsel %vm3591_vm2, %v5101_v14, 0.0  ;;  %v3667_v30 = vmul.f32 %v5101_v14, %v5101_v14  ;;  %v5058_v31 = vpop.f32.mrb[8].mxu0 }
 0x1e2   : > { %v3604_v32 = vadd.f32 %v3603_v29, %v3602_v23  ;;  %v3703_v34 = vadd.f32 %v3702_v26, %v3701_v18  ;;  %v5102_v35 = vadd.f32 %v5058_v31, %v4808_v43  ;;  %v3440_v36 = vpop.f32.mrb[9].mxu0  ;;  %v3706_v51 = vsel %vm3591_vm2, %v3668_v27, 0.0 }
 0x1e3   : > { %v3704_v39 = vsel %vm3591_vm2, %v3667_v30, 0.0  ;;  %v5103_v40 = vadd.f32 %v3440_v36, %v1489_v44 }
 0x1e4   : > { %v3705_v41 = vadd.f32 %v3704_v39, %v3703_v34  ;;  %v3606_v42 = vadd.f32 %v3605_v38, %v3604_v32  ;;  %v3670_v52 = vmul.f32 %v5102_v35, %v5102_v35  ;;  %v3609_v62 = vsel %vm3591_vm2, %v5102_v35, 0.0 }
 0x1e5   : > { %v3607_v53 = vsel %vm3591_vm2, %v5103_v40, 0.0  ;;  %v3669_v54 = vmul.f32 %v5103_v40, %v5103_v40  ;;  %v5061_v56 = vpop.f32.mrb[10].mxu0 }
 0x1e6   : > { %v3608_v58 = vadd.f32 %v3607_v53, %v3606_v42  ;;  %v3707_v59 = vadd.f32 %v3706_v51, %v3705_v41  ;;  %v5104_v60 = vadd.f32 %v5061_v56, %v6450_v45  ;;  %v3450_v43 = vpop.f32.mrb[11].mxu0  ;;  %v3710_v4 = vsel %vm3591_vm2, %v3670_v52, 0.0 }
 0x1e7   : > { %v3708_v63 = vsel %vm3591_vm2, %v3669_v54, 0.0  ;;  %v5105_v44 = vadd.f32 %v3450_v43, %v6452_v46 }
 0x1e8   : > { %v3709_v0 = vadd.f32 %v3708_v63, %v3707_v59  ;;  %v3610_v2 = vadd.f32 %v3609_v62, %v3608_v58  ;;  %v3672_v5 = vmul.f32 %v5104_v60, %v5104_v60  ;;  %v3613_v28 = vsel %vm3591_vm2, %v5104_v60, 0.0 }
 0x1e9   : > { %v3611_v6 = vsel %vm3591_vm2, %v5105_v44, 0.0  ;;  %v3671_v7 = vmul.f32 %v5105_v44, %v5105_v44  ;;  %v5064_v9 = vpop.f32.mrb[12].mxu0 }
 0x1ea   : > { %v3612_v10 = vadd.f32 %v3611_v6, %v3610_v2  ;;  %v3711_v55 = vadd.f32 %v3710_v4, %v3709_v0  ;;  %v5106_v45 = vadd.f32 %v5064_v9, %v6454_v47  ;;  %v3460_v57 = vpop.f32.mrb[13].mxu0  ;;  %v3714_v11 = vsel %vm3591_vm2, %v3672_v5, 0.0 }
 0x1eb   : > { %v3712_v24 = vsel %vm3591_vm2, %v3671_v7, 0.0  ;;  %v5107_v46 = vadd.f32 %v3460_v57, %v6456_v48 }
 0x1ec   : > { %v3713_v25 = vadd.f32 %v3712_v24, %v3711_v55  ;;  %v3614_v8 = vadd.f32 %v3613_v28, %v3612_v10  ;;  %v3674_v13 = vmul.f32 %v5106_v45, %v5106_v45  ;;  %v3617_v33 = vsel %vm3591_vm2, %v5106_v45, 0.0 }
 0x1ed   : > { %v3615_v15 = vsel %vm3591_vm2, %v5107_v46, 0.0  ;;  %v3673_v17 = vmul.f32 %v5107_v46, %v5107_v46  ;;  %v5067_v19 = vpop.f32.mrb[14].mxu0 }
 0x1ee   : > { %v3616_v21 = vadd.f32 %v3615_v15, %v3614_v8  ;;  %v3715_v22 = vadd.f32 %v3714_v11, %v3713_v25  ;;  %v5108_v47 = vadd.f32 %v5067_v19, %v6458_v49  ;;  %v3470_v37 = vpop.f32.mrb[15].mxu0  ;;  %v3718_v1 = vsel %vm3591_vm2, %v3674_v13, 0.0 }
 0x1ef   : > { %v3716_v12 = vsel %vm3591_vm2, %v3673_v17, 0.0  ;;  %v5109_v48 = vadd.f32 %v3470_v37, %v6460_v50 }
 0x1f0   : > { %v3717_v16 = vadd.f32 %v3716_v12, %v3715_v22  ;;  %v3618_v20 = vadd.f32 %v3617_v33, %v3616_v21  ;;  %v3676_v3 = vmul.f32 %v5108_v47, %v5108_v47  ;;  %v3621_v31 = vsel %vm3591_vm2, %v5108_v47, 0.0 }
 0x1f1   : > { %v3619_v61 = vsel %vm3591_vm2, %v5109_v48, 0.0  ;;  %v3675_v14 = vmul.f32 %v5109_v48, %v5109_v48  ;;  %v4870_v18 = vpop.f32.mrb[16].mxu1  ;;  %v5070_v23 = vpop.f32.mrb[16].mxu0 }
 0x1f2   : > { %v3620_v26 = vadd.f32 %v3619_v61, %v3618_v20  ;;  %v3719_v27 = vadd.f32 %v3718_v1, %v3717_v16  ;;  %v5110_v49 = vadd.f32 %v5070_v23, %v4870_v18  ;;  %v1919_v29 = vpop.f32.mrb[17].mxu1  ;;  %v3480_v30 = vpop.f32.mrb[17].mxu0  ;;  %v3722_v36 = vsel %vm3591_vm2, %v3676_v3, 0.0 }
 0x1f3   : > { %v3720_v32 = vsel %vm3591_vm2, %v3675_v14, 0.0  ;;  %v5111_v50 = vadd.f32 %v3480_v30, %v1919_v29 }
 0x1f4   : > { %v3721_v34 = vadd.f32 %v3720_v32, %v3719_v27  ;;  %v3622_v35 = vadd.f32 %v3621_v31, %v3620_v26  ;;  %v3678_v38 = vmul.f32 %v5110_v49, %v5110_v49  ;;  %v3625_v58 = vsel %vm3591_vm2, %v5110_v49, 0.0 }
 0x1f5   : > { %v3623_v39 = vsel %vm3591_vm2, %v5111_v50, 0.0  ;;  %v3677_v40 = vmul.f32 %v5111_v50, %v5111_v50  ;;  %v4873_v41 = vpop.f32.mrb[18].mxu1  ;;  %v5073_v42 = vpop.f32.mrb[18].mxu0 }
 0x1f6   : > { %v3624_v51 = vadd.f32 %v3623_v39, %v3622_v35  ;;  %v3723_v52 = vadd.f32 %v3722_v36, %v3721_v34  ;;  %v5112_v53 = vadd.f32 %v5073_v42, %v4873_v41  ;;  %v1929_v54 = vpop.f32.mrb[19].mxu1  ;;  %v3490_v56 = vpop.f32.mrb[19].mxu0  ;;  %v3726_v63 = vsel %vm3591_vm2, %v3678_v38, 0.0 }
 0x1f7   : > { %v3724_v59 = vsel %vm3591_vm2, %v3677_v40, 0.0  ;;  %v5113_v60 = vadd.f32 %v3490_v56, %v1929_v54 }
 0x1f8   : > { %v3725_v43 = vadd.f32 %v3724_v59, %v3723_v52  ;;  %v3626_v62 = vadd.f32 %v3625_v58, %v3624_v51  ;;  %v3680_v44 = vmul.f32 %v5112_v53, %v5112_v53  ;;  %v3629_v45 = vsel %vm3591_vm2, %v5112_v53, 0.0 }
 0x1f9   : > { %v3627_v0 = vsel %vm3591_vm2, %v5113_v60, 0.0  ;;  %v3679_v2 = vmul.f32 %v5113_v60, %v5113_v60  ;;  %v4876_v4 = vpop.f32.mrb[20].mxu1  ;;  %v5076_v5 = vpop.f32.mrb[20].mxu0 }
 0x1fa   : > { %v3628_v6 = vadd.f32 %v3627_v0, %v3626_v62  ;;  %v3727_v7 = vadd.f32 %v3726_v63, %v3725_v43  ;;  %v5114_v9 = vadd.f32 %v5076_v5, %v4876_v4  ;;  %v1939_v10 = vpop.f32.mrb[21].mxu1  ;;  %v3500_v55 = vpop.f32.mrb[21].mxu0  ;;  %v3730_v25 = vsel %vm3591_vm2, %v3680_v44, 0.0 }
 0x1fb   : > { %v3728_v57 = vsel %vm3591_vm2, %v3679_v2, 0.0  ;;  %v5115_v28 = vadd.f32 %v3500_v55, %v1939_v10 }
 0x1fc   : > { %v3729_v24 = vadd.f32 %v3728_v57, %v3727_v7  ;;  %v3630_v46 = vadd.f32 %v3629_v45, %v3628_v6  ;;  %v3682_v8 = vmul.f32 %v5114_v9, %v5114_v9  ;;  %v3633_v33 = vsel %vm3591_vm2, %v5114_v9, 0.0 }
 0x1fd   : > { %v3631_v11 = vsel %vm3591_vm2, %v5115_v28, 0.0  ;;  %v3681_v13 = vmul.f32 %v5115_v28, %v5115_v28  ;;  %v4879_v15 = vpop.f32.mrb[22].mxu1  ;;  %v5079_v17 = vpop.f32.mrb[22].mxu0 }
 0x1fe   : > { %v3632_v19 = vadd.f32 %v3631_v11, %v3630_v46  ;;  %v3731_v21 = vadd.f32 %v3730_v25, %v3729_v24  ;;  %v5116_v22 = vadd.f32 %v5079_v17, %v4879_v15  ;;  %v1949_v47 = vpop.f32.mrb[23].mxu1  ;;  %v3510_v37 = vpop.f32.mrb[23].mxu0  ;;  %v3734_v1 = vsel %vm3591_vm2, %v3682_v8, 0.0 }
 0x1ff   : > { %v3732_v12 = vsel %vm3591_vm2, %v3681_v13, 0.0  ;;  %v5117_v48 = vadd.f32 %v3510_v37, %v1949_v47 }
 0x200   : > { %v3733_v16 = vadd.f32 %v3732_v12, %v3731_v21  ;;  %v3634_v20 = vadd.f32 %v3633_v33, %v3632_v19  ;;  %v3684_v3 = vmul.f32 %v5116_v22, %v5116_v22  ;;  %v3637_v31 = vsel %vm3591_vm2, %v5116_v22, 0.0 }
 0x201   : > { %v3635_v61 = vsel %vm3591_vm2, %v5117_v48, 0.0  ;;  %v3683_v14 = vmul.f32 %v5117_v48, %v5117_v48  ;;  %v4882_v18 = vpop.f32.mrb[24].mxu1  ;;  %v5082_v23 = vpop.f32.mrb[24].mxu0 }
 0x202   : > { %v3636_v26 = vadd.f32 %v3635_v61, %v3634_v20  ;;  %v3735_v27 = vadd.f32 %v3734_v1, %v3733_v16  ;;  %v5118_v49 = vadd.f32 %v5082_v23, %v4882_v18  ;;  %v1959_v29 = vpop.f32.mrb[25].mxu1  ;;  %v3520_v30 = vpop.f32.mrb[25].mxu0  ;;  %v3738_v36 = vsel %vm3591_vm2, %v3684_v3, 0.0 }
 0x203   : > { %v3736_v32 = vsel %vm3591_vm2, %v3683_v14, 0.0  ;;  %v5119_v50 = vadd.f32 %v3520_v30, %v1959_v29 }
 0x204   : > { %v3737_v34 = vadd.f32 %v3736_v32, %v3735_v27  ;;  %v3638_v35 = vadd.f32 %v3637_v31, %v3636_v26  ;;  %v3686_v38 = vmul.f32 %v5118_v49, %v5118_v49  ;;  %v3641_v58 = vsel %vm3591_vm2, %v5118_v49, 0.0 }
 0x205   : > { %v3639_v39 = vsel %vm3591_vm2, %v5119_v50, 0.0  ;;  %v3685_v40 = vmul.f32 %v5119_v50, %v5119_v50  ;;  %v4885_v41 = vpop.f32.mrb[26].mxu1  ;;  %v5085_v42 = vpop.f32.mrb[26].mxu0 }
 0x206   : > { %v3640_v51 = vadd.f32 %v3639_v39, %v3638_v35  ;;  %v3739_v52 = vadd.f32 %v3738_v36, %v3737_v34  ;;  %v5120_v53 = vadd.f32 %v5085_v42, %v4885_v41  ;;  %v1969_v54 = vpop.f32.mrb[27].mxu1  ;;  %v3530_v56 = vpop.f32.mrb[27].mxu0  ;;  %v3742_v63 = vsel %vm3591_vm2, %v3686_v38, 0.0 }
 0x207   : > { %v3740_v59 = vsel %vm3591_vm2, %v3685_v40, 0.0  ;;  %v5121_v60 = vadd.f32 %v3530_v56, %v1969_v54 }
 0x208   : > { %v3741_v43 = vadd.f32 %v3740_v59, %v3739_v52  ;;  %v3642_v62 = vadd.f32 %v3641_v58, %v3640_v51  ;;  %v3688_v44 = vmul.f32 %v5120_v53, %v5120_v53  ;;  %v3645_v45 = vsel %vm3591_vm2, %v5120_v53, 0.0 }
 0x209   : > { %v3643_v0 = vsel %vm3591_vm2, %v5121_v60, 0.0  ;;  %v3687_v2 = vmul.f32 %v5121_v60, %v5121_v60  ;;  %v4888_v4 = vpop.f32.mrb[28].mxu1  ;;  %v5088_v5 = vpop.f32.mrb[28].mxu0 }
 0x20a   : > { %v3644_v6 = vadd.f32 %v3643_v0, %v3642_v62  ;;  %v3743_v7 = vadd.f32 %v3742_v63, %v3741_v43  ;;  %v5122_v9 = vadd.f32 %v5088_v5, %v4888_v4  ;;  %v1979_v10 = vpop.f32.mrb[29].mxu1  ;;  %v3540_v55 = vpop.f32.mrb[29].mxu0  ;;  %v3746_v25 = vsel %vm3591_vm2, %v3688_v44, 0.0 }
 0x20b   : > { %v3744_v57 = vsel %vm3591_vm2, %v3687_v2, 0.0  ;;  %v5123_v28 = vadd.f32 %v3540_v55, %v1979_v10 }
 0x20c   : > { %v3745_v24 = vadd.f32 %v3744_v57, %v3743_v7  ;;  %v3646_v46 = vadd.f32 %v3645_v45, %v3644_v6  ;;  %v3690_v8 = vmul.f32 %v5122_v9, %v5122_v9  ;;  %v3649_v33 = vsel %vm3591_vm2, %v5122_v9, 0.0 }
 0x20d   : > { %v3647_v11 = vsel %vm3591_vm2, %v5123_v28, 0.0  ;;  %v3689_v13 = vmul.f32 %v5123_v28, %v5123_v28  ;;  %v4891_v15 = vpop.f32.mrb[30].mxu1  ;;  %v5091_v17 = vpop.f32.mrb[30].mxu0 }
 0x20e   : > { %v3648_v19 = vadd.f32 %v3647_v11, %v3646_v46  ;;  %v3747_v21 = vadd.f32 %v3746_v25, %v3745_v24  ;;  %v5124_v22 = vadd.f32 %v5091_v17, %v4891_v15  ;;  %v1989_v47 = vpop.f32.mrb[31].mxu1  ;;  %v3550_v37 = vpop.f32.mrb[31].mxu0  ;;  %v3750_v1 = vsel %vm3591_vm2, %v3690_v8, 0.0 }
 0x20f   : > { %v3748_v12 = vsel %vm3591_vm2, %v3689_v13, 0.0  ;;  %v5125_v48 = vadd.f32 %v3550_v37, %v1989_v47 }
 0x210   : > { %v3749_v16 = vadd.f32 %v3748_v12, %v3747_v21  ;;  %v3650_v20 = vadd.f32 %v3649_v33, %v3648_v19  ;;  %v3692_v3 = vmul.f32 %v5124_v22, %v5124_v22  ;;  %v3653_v26 = vsel %vm3591_vm2, %v5124_v22, 0.0 }
 0x211   : > { %v3651_v61 = vsel %vm3591_vm2, %v5125_v48, 0.0  ;;  %v3691_v14 = vmul.f32 %v5125_v48, %v5125_v48 }
 0x212   : > { %v3652_v18 = vadd.f32 %v3651_v61, %v3650_v20  ;;  %v3751_v23 = vadd.f32 %v3750_v1, %v3749_v16  ;;  %v3754_v30 = vsel %vm3591_vm2, %v3692_v3, 0.0 }
 0x213   : > { %v3752_v27 = vsel %vm3591_vm2, %v3691_v14, 0.0 }
 0x214   : > { %v3654_v49 = vadd.f32 %v3653_v26, %v3652_v18  ;;  %v3753_v29 = vadd.f32 %v3752_v27, %v3751_v23 }
 0x216   : > { %v3655_v31 = vrot.slane %v3654_v49, 4  ;;  %v3755_v32 = vadd.f32 %v3754_v30, %v3753_v29 }
 0x218   : > { %v3656_v50 = vadd.f32 %v3655_v31, %v3654_v49  ;;  %v3756_v34 = vrot.slane %v3755_v32, 4 }
 0x21a   : > { %v3657_v35 = vrot.slane %v3656_v50, 2  ;;  %v3757_v36 = vadd.f32 %v3756_v34, %v3755_v32 }
 0x21c   : > { %v3658_v38 = vadd.f32 %v3657_v35, %v3656_v50  ;;  %v3758_v39 = vrot.slane %v3757_v36, 2 }
 0x21e   : > { %v3659_v40 = vrot.slane %v3658_v38, 1  ;;  %v3759_v41 = vadd.f32 %v3758_v39, %v3757_v36 }
 0x220   : > { %v3660_v42 = vadd.f32 %v3659_v40, %v3658_v38  ;;  %v3760_v51 = vrot.slane %v3759_v41, 1 }
 0x222   : > { %v3761_v52 = vadd.f32 %v3760_v51, %v3759_v41  ;;  %3763 = vst.msk [vmem:[%s136_s28] sm:$0x1] %vm3762_vm3, %v3660_v42 }
 0x224   : > { %3764 = vst.msk [vmem:[%s136_s28 + $0x1] sm:$0x1] %vm3762_vm3, %v3761_v52 }
 0x225   : > { %5403 = shalt.err (!%p5400_p3)
}
 0x226   : > { %s5404_s14 = scalar_lea.hbm %s6537_s4, 32  ;;  %s5408_s21 = scalar_lea.hbm %s6581_s2, 64 }
 0x227   : > { %p5405_p4 = scmp.ne.s32.totalorder %s6537_s4, %s5404_s14  ;;  %p5409_p9 = scmp.lt.u32.totalorder %s6537_s4, %s6581_s2 }
 0x228   : > { %p5410_p10 = scmp.lt.u32.totalorder %s5408_s21, %s5404_s14  ;;  %p5412_p12 = scmp.lt.u32.totalorder %s5404_s14, %s6537_s4 }
 0x229   : > { %p5406_p7 = pnand %p5405_p4, %p5508_p5 }
 0x22a   : > { %p5411_p11 = por %p5410_p10, %p5409_p9 }
 0x22b   : > { %p5407_p8 = pneg %p5406_p7 }
 0x22c   : > { %p5413_p13 = por %p5412_p12, %p5411_p11 }
 0x22e   : > { %p5414_p0 = pnand %p5413_p13, %p5407_p8 }
 0x230   : > { %5417 = shalt.err (!%p5414_p0)
}
 0x231   : > { %5351 = dma.vmem_to_hbm [thread:$0]  (%p5508_p5), %s6539_s29, 32, %s6537_s4, %s3766_s5  }
 0x232 PF: > { %p5357_p1 = scmp.ge.s32.totalorder %s5452_s12, 2  ;;  %s3791_s24 = sand.u32 1, %s5440_s9  }
 0x233   : > { %s3792_s25 = scalar_lea.sflag [#allocation3], %s3791_s24 }
 0x234   : > { %p5354_p2 = pnand %p5357_p1, %p5512_p6 }
 0x236   : > { %5435 = dma.done.wait (!%p5354_p2), %s3792_s25, 32  }
 0x237   : > { %5437 = vsyncadd (!%p5354_p2), %s3792_s25, 4294967264  ;;  %p12_p3 = scmp.ge.s32.totalorder %s5495_s15, 4   ;;  %s6693_s9 = smov %s5444_s10 }
 0x238   : > { %s6694_s10 = smov %s5448_s11  ;;  %s6695_s11 = smov %s5506_s18 }
 0x239   : > { %s6696_s12 = smov %s5495_s15  ;;  %14 = sbr.rel (!%p12_p3) target bundleno = 3 (0x3), region = 73 }
 0x240   :  { %3797 = vsyncpa [#allocation3], 1 }
 0x241   :  { %3799 = vsyncpa [#allocation3 + $0x1], 1 }

</bundles_post_ra>
